<compile_context>
chip_gen: v6e
topology: v6e:2x2x1
jax: 0.10.0
libtpu: 0.0.40
codegen_flags: <defaults>
</compile_context>

<pallas_src>
import jax
import jax.numpy as jnp
from jax.experimental import pallas as pl
from jax.experimental.pallas import tpu as pltpu

NUM_FRAMES = 1
ACTION_SIZE = 5          # CarRacing-v2 discrete action space
N_PAD = 128              # fc2 output padded to a full lane tile
R_OUT = 81               # 9 x 9 conv2 output positions per image
R_PAD = 96               # rows padded to a bf16 sublane-tile multiple (free reshapes)
K_COLS = 400             # 20 x 20 deduplicated receptive field per conv2 output
K_PAD = 512              # im2col K padded to a lane-tile multiple
FLAT = R_PAD * 32        # 3072 features fed to fc1 (pad rows hit zero fc1 weights)
CONV_BBLK = 8            # max images per conv grid step (~4 MiB VMEM; raisable on v5e/v6e)


def _round_up(x, m):
    return (x + m - 1) // m * m


# ----------------------------- Pallas kernels -----------------------------

def conv_kernel(p1_ref, w1_ref, b1_ref, w2_ref, b2_ref, h2_ref):
    """Fused conv1 + conv2 (+bias +ReLU) for a block of images.

    p1_ref: (Bblk, 96, 512) bf16  conv2-level im2col (row = oh2*9+ow2, col = dr*20+dc)
    w1_ref: (512, 256)      bf16  conv1 weight replicated per conv2 tap (block sparse)
    b1_ref: (1, 256)        f32   conv1 bias tiled over the 16 taps
    w2_ref: (256, 32)       bf16  conv2 weight, row = (kh*4+kw)*16 + ci
    b2_ref: (1, 32)         f32
    h2_ref: (Bblk, 96, 32)  bf16  conv2 output (rows >= 81 are junk, zeroed in fc1w)
    """
    bblk = p1_ref.shape[0]
    p1 = p1_ref[...].reshape(bblk * R_PAD, K_PAD)          # tile-aligned leading merge
    h1 = jnp.dot(p1, w1_ref[...], preferred_element_type=jnp.float32)
    h1 = jnp.maximum(h1 + b1_ref[...], 0.0).astype(jnp.bfloat16)   # (Bblk*96, 256)
    h2 = jnp.dot(h1, w2_ref[...], preferred_element_type=jnp.float32)
    h2 = jnp.maximum(h2 + b2_ref[...], 0.0)                # (Bblk*96, 32)
    h2_ref[...] = h2.astype(jnp.bfloat16).reshape(bblk, R_PAD, 32)


def fc_kernel(x_ref, w1_ref, b1_ref, w2_ref, b2_ref, o_ref):
    """Fused fc1 + ReLU + fc2 on an M-tile of the batch (lane-dense output)."""
    h = jnp.dot(x_ref[...], w1_ref[...], preferred_element_type=jnp.float32)
    h = jnp.maximum(h + b1_ref[...], 0.0).astype(jnp.bfloat16)
    o_ref[...] = jnp.dot(h, w2_ref[...], preferred_element_type=jnp.float32) + b2_ref[...]


# ----------------------------- Pallas wrappers -----------------------------

_COMPILER_PARAMS = pltpu.CompilerParams(
    dimension_semantics=("parallel",),
    vmem_limit_bytes=32 * 1024 * 1024,   # budgeted against v7x's 64 MiB VMEM
)


def conv_stage(p1, w1w, b1w, w2f, b2):
    B = p1.shape[0]
    # >= 2 grid steps whenever B >= 2 (keeps both v7x TensorCores busy), <= CONV_BBLK imgs/step.
    bblk = min(CONV_BBLK, max(1, -(-B // 2)))
    Bp = _round_up(B, bblk)
    if Bp != B:
        p1 = jnp.pad(p1, ((0, Bp - B), (0, 0), (0, 0)))
    out = pl.pallas_call(
        conv_kernel,
        out_shape=jax.ShapeDtypeStruct((Bp, R_PAD, 32), jnp.bfloat16),
        grid=(Bp // bblk,),
        in_specs=[
            pl.BlockSpec((bblk, R_PAD, K_PAD), lambda b: (b, 0, 0)),
            pl.BlockSpec((K_PAD, 256), lambda b: (0, 0)),     # resident weights
            pl.BlockSpec((1, 256), lambda b: (0, 0)),
            pl.BlockSpec((256, 32), lambda b: (0, 0)),
            pl.BlockSpec((1, 32), lambda b: (0, 0)),
        ],
        out_specs=pl.BlockSpec((bblk, R_PAD, 32), lambda b: (b, 0, 0)),
        compiler_params=_COMPILER_PARAMS,
    )(p1, w1w, b1w, w2f, b2)
    return out[:B]


def fc_stage(x, fc1w, fc1b, fc2w, fc2b):
    B = x.shape[0]
    # Split the batch into >= 2 parallel steps when possible (v7x dual-TC), tile <= 128 rows.
    bm = min(128, _round_up(max(-(-B // 2), 1), 8))
    Bp = _round_up(B, bm)
    xp = jnp.pad(x, ((0, Bp - B), (0, 0))) if Bp != B else x
    out = pl.pallas_call(
        fc_kernel,
        out_shape=jax.ShapeDtypeStruct((Bp, N_PAD), jnp.float32),
        grid=(Bp // bm,),
        in_specs=[
            pl.BlockSpec((bm, FLAT), lambda m: (m, 0)),
            pl.BlockSpec((FLAT, 256), lambda m: (0, 0)),      # resident weights
            pl.BlockSpec((1, 256), lambda m: (0, 0)),
            pl.BlockSpec((256, N_PAD), lambda m: (0, 0)),
            pl.BlockSpec((1, N_PAD), lambda m: (0, 0)),
        ],
        out_specs=pl.BlockSpec((bm, N_PAD), lambda m: (m, 0)),
        compiler_params=_COMPILER_PARAMS,
    )(xp, fc1w, fc1b, fc2w, fc2b)
    return out[:B, :]


# ----------------------------- XLA glue -----------------------------

def _grayscale_crop(state):
    """crop[:, 0:84, 6:90, :] then grayscale/255 directly from NHWC (no transpose)."""
    crop = state[:, 0:84, 6:90, :]
    gray = (0.2989 * crop[..., 0] + 0.587 * crop[..., 1]
            + 0.114 * crop[..., 2]) * (1.0 / 255.0)          # (B, 84, 84) f32
    return gray.astype(jnp.bfloat16)


def _conv2_im2col(gray):
    """Deduplicated conv2-level im2col via static stride-8 slices (no gather, no transpose).

    For conv2 output (oh2, ow2) the receptive field in the cropped gray image is the
    20x20 block starting at (8*oh2, 8*ow2).  Row r = oh2*9 + ow2, column = dr*20 + dc.
    Rows padded 81 -> 96, columns 400 -> 512 (zero weight rows absorb the padding).
    """
    B = gray.shape[0]
    cols = []
    for dr in range(20):
        for dc in range(20):
            cols.append(gray[:, dr:dr + 65:8, dc:dc + 65:8])  # (B, 9, 9)
    pat = jnp.stack(cols, axis=-1)                            # (B, 9, 9, 400)
    pat = pat.reshape(B, R_OUT, K_COLS)
    pat = jnp.pad(pat, ((0, 0), (0, R_PAD - R_OUT), (0, K_PAD - K_COLS)))
    return pat                                                # (B, 96, 512) bf16


# ----------------------------- parameters -----------------------------

def init_params(key):
    """Deterministic synthetic parameters (PyTorch-default-style uniform init),
    repacked once into the kernel-friendly layouts described above."""
    def uniform(k, shape, fan_in):
        bound = 1.0 / jnp.sqrt(jnp.float32(fan_in))
        return jax.random.uniform(k, shape, jnp.float32, -bound, bound)

    ks = jax.random.split(key, 8)
    w1 = uniform(ks[0], (16, NUM_FRAMES, 8, 8), NUM_FRAMES * 64)     # conv1.weight
    b1 = uniform(ks[1], (16,), NUM_FRAMES * 64)                      # conv1.bias
    w2 = uniform(ks[2], (32, 16, 4, 4), 16 * 16)                     # conv2.weight
    b2 = uniform(ks[3], (32,), 16 * 16)                              # conv2.bias
    fw1 = uniform(ks[4], (256, 32 * 81), 32 * 81)                    # fc1.weight
    fb1 = uniform(ks[5], (256,), 32 * 81)                            # fc1.bias
    fw2 = uniform(ks[6], (ACTION_SIZE, 256), 256)                    # fc2.weight
    fb2 = uniform(ks[7], (ACTION_SIZE,), 256)                        # fc2.bias

    # conv1 weight replicated per conv2 tap into a (512, 256) block-sparse matrix:
    #   W[(4*kh + k1h)*20 + (4*kw + k1w), (kh*4+kw)*16 + c] = w1[c, 0, k1h, k1w]
    w1mat = w1.reshape(16, 64).T                                     # (64, 16): row k1h*8+k1w
    w1w = jnp.zeros((K_PAD, 256), jnp.float32)
    for kh in range(4):
        for kw in range(4):
            t = kh * 4 + kw
            block = jnp.zeros((K_PAD, 16), jnp.float32)
            for k1h in range(8):
                row0 = (4 * kh + k1h) * 20 + 4 * kw
                block = block.at[row0:row0 + 8, :].set(w1mat[k1h * 8:(k1h + 1) * 8, :])
            w1w = w1w.at[:, t * 16:(t + 1) * 16].set(block)
    b1w = jnp.tile(b1, 16).reshape(1, 256)                           # bias per tap copy

    # conv2 weight as (256, 32): row = (kh*4+kw)*16 + ci, matching the h1w lane order.
    w2f = jnp.transpose(w2, (2, 3, 1, 0)).reshape(256, 32)

    # fc1 weight re-laid to the kernel's (row = oh2*9+ow2, channel) activation order;
    # rows 81..95 (the h2 pad/junk rows) get zero weights so no masking is needed.
    w3 = jnp.transpose(fw1.reshape(256, 32, R_OUT), (2, 1, 0))       # (81, 32, 256)
    w3 = jnp.pad(w3, ((0, R_PAD - R_OUT), (0, 0), (0, 0)))           # (96, 32, 256)
    fc1w = w3.reshape(FLAT, 256)

    # fc2: pad N 5 -> 128 for a lane-dense output store; extra cols are zero.
    fc2w = jnp.pad(fw2.T, ((0, 0), (0, N_PAD - ACTION_SIZE)))
    fc2b = jnp.pad(fb2, (0, N_PAD - ACTION_SIZE))

    return {
        "w1w": w1w.astype(jnp.bfloat16), "b1w": b1w,
        "w2f": w2f.astype(jnp.bfloat16), "b2": b2.reshape(1, 32),
        "fc1w": fc1w.astype(jnp.bfloat16), "fc1b": fb1.reshape(1, 256),
        "fc2w": fc2w.astype(jnp.bfloat16), "fc2b": fc2b.reshape(1, N_PAD),
    }


# ----------------------------- forward -----------------------------

@jax.jit
def policy_forward(state, params):
    """state: (B, 96, 96, 3) float32 in [0, 255] -> (B, ACTION_SIZE) Q-values."""
    B = state.shape[0]
    gray = _grayscale_crop(state)                  # (B, 84, 84) bf16
    p1 = _conv2_im2col(gray)                       # (B, 96, 512) bf16
    h2 = conv_stage(p1, params["w1w"], params["b1w"],
                    params["w2f"], params["b2"])   # (B, 96, 32) bf16
    x = h2.reshape(B, FLAT)                        # free row-major reshape
    q = fc_stage(x, params["fc1w"], params["fc1b"],
                 params["fc2w"], params["fc2b"])   # (B, 128) f32
    return q[:, :ACTION_SIZE]

# TODO(synk): Policy's gym env, replay buffer, epsilon-greedy sampling, training
# loop, Adam optimizer and checkpoint/plotting code have no Pallas equivalent;
# only the Q-network forward pass is implemented.


if __name__ == "__main__":
    key = jax.random.PRNGKey(0)
    kp, kx = jax.random.split(key)

    params = init_params(kp)
    # CarRacing observation: (B, 96, 96, 3), raw pixels in [0, 255]
    state = jax.random.uniform(kx, (2, 96, 96, 3), jnp.float32, 0.0, 255.0)

    q_values = policy_forward(state, params)
    jax.block_until_ready(q_values)
    assert q_values.shape == (2, ACTION_SIZE)
    print("KERNEL_OK")
</pallas_src>

<mosaic_0001>
module attributes {stable_mosaic.version = 11 : i64} {
  func.func @conv_kernel(%arg0: i32, %arg1: memref<1x96x512xbf16, #tpu.memory_space<vmem>>, %arg2: memref<512x256xbf16, #tpu.memory_space<vmem>>, %arg3: memref<1x256xf32, #tpu.memory_space<vmem>>, %arg4: memref<256x32xbf16, #tpu.memory_space<vmem>>, %arg5: memref<1x32xf32, #tpu.memory_space<vmem>>, %arg6: memref<1x96x32xbf16, #tpu.memory_space<vmem>>) attributes {dimension_semantics = [#tpu.dimension_semantics<parallel>], iteration_bounds = array<i64: 2>, scalar_prefetch = 0 : i64, scratch_operands = 0 : i64, tpu.core_type = #tpu.core_type<tc>, window_params = [{transform_indices = @transform_0, window_bounds = array<i64: 1, 96, 512>}, {pipeline_mode = #tpu.pipeline_mode<synchronous>, transform_indices = @transform_1, window_bounds = array<i64: 512, 256>}, {pipeline_mode = #tpu.pipeline_mode<synchronous>, transform_indices = @transform_2, window_bounds = array<i64: 1, 256>}, {pipeline_mode = #tpu.pipeline_mode<synchronous>, transform_indices = @transform_3, window_bounds = array<i64: 256, 32>}, {pipeline_mode = #tpu.pipeline_mode<synchronous>, transform_indices = @transform_4, window_bounds = array<i64: 1, 32>}, {transform_indices = @transform_5, window_bounds = array<i64: 1, 96, 32>}]} {
    %c0 = arith.constant 0 : index
    %c0_0 = arith.constant 0 : index
    %c0_1 = arith.constant 0 : index
    %0 = vector.load %arg1[%c0, %c0_0, %c0_1] : memref<1x96x512xbf16, #tpu.memory_space<vmem>>, vector<1x96x512xbf16>
    %1 = vector.shape_cast %0 : vector<1x96x512xbf16> to vector<96x512xbf16>
    %c0_2 = arith.constant 0 : index
    %c0_3 = arith.constant 0 : index
    %2 = vector.load %arg2[%c0_2, %c0_3] : memref<512x256xbf16, #tpu.memory_space<vmem>>, vector<512x256xbf16>
    %cst = arith.constant dense<0.000000e+00> : vector<96x256xf32>
    %3 = tpu.matmul %1, %2, %cst {dimension_numbers = #tpu.dot_dimension_numbers<[1], [0], [0], [1], [0, 0, 1, 1], [], []>} : vector<96x512xbf16>, vector<512x256xbf16>, vector<96x256xf32> -> vector<96x256xf32>
    %c0_4 = arith.constant 0 : index
    %c0_5 = arith.constant 0 : index
    %4 = vector.load %arg3[%c0_4, %c0_5] : memref<1x256xf32, #tpu.memory_space<vmem>>, vector<1x256xf32>
    %5 = vector.broadcast %4 : vector<1x256xf32> to vector<96x256xf32>
    %6 = arith.addf %3, %5 : vector<96x256xf32>
    %cst_6 = arith.constant 0.000000e+00 : f32
    %7 = vector.broadcast %cst_6 : f32 to vector<96x256xf32>
    %8 = arith.maximumf %6, %7 : vector<96x256xf32>
    %9 = arith.truncf %8 : vector<96x256xf32> to vector<96x256xbf16>
    %c0_7 = arith.constant 0 : index
    %c0_8 = arith.constant 0 : index
    %10 = vector.load %arg4[%c0_7, %c0_8] : memref<256x32xbf16, #tpu.memory_space<vmem>>, vector<256x32xbf16>
    %cst_9 = arith.constant dense<0.000000e+00> : vector<96x32xf32>
    %11 = tpu.matmul %9, %10, %cst_9 {dimension_numbers = #tpu.dot_dimension_numbers<[1], [0], [0], [1], [0, 0, 1, 1], [], []>} : vector<96x256xbf16>, vector<256x32xbf16>, vector<96x32xf32> -> vector<96x32xf32>
    %c0_10 = arith.constant 0 : index
    %c0_11 = arith.constant 0 : index
    %12 = vector.load %arg5[%c0_10, %c0_11] : memref<1x32xf32, #tpu.memory_space<vmem>>, vector<1x32xf32>
    %13 = vector.broadcast %12 : vector<1x32xf32> to vector<96x32xf32>
    %14 = arith.addf %11, %13 : vector<96x32xf32>
    %cst_12 = arith.constant 0.000000e+00 : f32
    %15 = vector.broadcast %cst_12 : f32 to vector<96x32xf32>
    %16 = arith.maximumf %14, %15 : vector<96x32xf32>
    %17 = arith.truncf %16 : vector<96x32xf32> to vector<96x32xbf16>
    %18 = vector.shape_cast %17 : vector<96x32xbf16> to vector<1x96x32xbf16>
    %c0_13 = arith.constant 0 : index
    %c0_14 = arith.constant 0 : index
    %c0_15 = arith.constant 0 : index
    %19 = vector.load %arg6[%c0_13, %c0_14, %c0_15] : memref<1x96x32xbf16, #tpu.memory_space<vmem>>, vector<1x96x32xbf16>
    tpu.vector_store %arg6[%c0_13, %c0_14, %c0_15], %18 {strides = array<i32>} : memref<1x96x32xbf16, #tpu.memory_space<vmem>>, vector<1x96x32xbf16>,
    return
  }
  func.func @transform_0(%arg0: i32) -> (i32, i32, i32) {
    %c0_i32 = arith.constant 0 : i32
    %c0_i32_0 = arith.constant 0 : i32
    %c0_i32_1 = arith.constant 0 : i32
    return %arg0, %c0_i32, %c0_i32_0 : i32, i32, i32
  }
  func.func @transform_1(%arg0: i32) -> (i32, i32) {
    %c0_i32 = arith.constant 0 : i32
    %c0_i32_0 = arith.constant 0 : i32
    %c0_i32_1 = arith.constant 0 : i32
    return %c0_i32, %c0_i32_0 : i32, i32
  }
  func.func @transform_2(%arg0: i32) -> (i32, i32) {
    %c0_i32 = arith.constant 0 : i32
    %c0_i32_0 = arith.constant 0 : i32
    %c0_i32_1 = arith.constant 0 : i32
    return %c0_i32, %c0_i32_0 : i32, i32
  }
  func.func @transform_3(%arg0: i32) -> (i32, i32) {
    %c0_i32 = arith.constant 0 : i32
    %c0_i32_0 = arith.constant 0 : i32
    %c0_i32_1 = arith.constant 0 : i32
    return %c0_i32, %c0_i32_0 : i32, i32
  }
  func.func @transform_4(%arg0: i32) -> (i32, i32) {
    %c0_i32 = arith.constant 0 : i32
    %c0_i32_0 = arith.constant 0 : i32
    %c0_i32_1 = arith.constant 0 : i32
    return %c0_i32, %c0_i32_0 : i32, i32
  }
  func.func @transform_5(%arg0: i32) -> (i32, i32, i32) {
    %c0_i32 = arith.constant 0 : i32
    %c0_i32_0 = arith.constant 0 : i32
    %c0_i32_1 = arith.constant 0 : i32
    return %arg0, %c0_i32, %c0_i32_0 : i32, i32, i32
  }
}

module attributes {stable_mosaic.version = 11 : i64} {
  func.func @fc_kernel(%arg0: i32, %arg1: memref<8x3072xbf16, #tpu.memory_space<vmem>>, %arg2: memref<3072x256xbf16, #tpu.memory_space<vmem>>, %arg3: memref<1x256xf32, #tpu.memory_space<vmem>>, %arg4: memref<256x128xbf16, #tpu.memory_space<vmem>>, %arg5: memref<1x128xf32, #tpu.memory_space<vmem>>, %arg6: memref<8x128xf32, #tpu.memory_space<vmem>>) attributes {dimension_semantics = [#tpu.dimension_semantics<parallel>], iteration_bounds = array<i64: 1>, scalar_prefetch = 0 : i64, scratch_operands = 0 : i64, tpu.core_type = #tpu.core_type<tc>, window_params = [{transform_indices = @transform_0, window_bounds = array<i64: 8, 3072>}, {pipeline_mode = #tpu.pipeline_mode<synchronous>, transform_indices = @transform_1, window_bounds = array<i64: 3072, 256>}, {pipeline_mode = #tpu.pipeline_mode<synchronous>, transform_indices = @transform_2, window_bounds = array<i64: 1, 256>}, {pipeline_mode = #tpu.pipeline_mode<synchronous>, transform_indices = @transform_3, window_bounds = array<i64: 256, 128>}, {pipeline_mode = #tpu.pipeline_mode<synchronous>, transform_indices = @transform_4, window_bounds = array<i64: 1, 128>}, {transform_indices = @transform_5, window_bounds = array<i64: 8, 128>}]} {
    %c0 = arith.constant 0 : index
    %c0_0 = arith.constant 0 : index
    %0 = vector.load %arg1[%c0, %c0_0] : memref<8x3072xbf16, #tpu.memory_space<vmem>>, vector<8x3072xbf16>
    %c0_1 = arith.constant 0 : index
    %c0_2 = arith.constant 0 : index
    %1 = vector.load %arg2[%c0_1, %c0_2] : memref<3072x256xbf16, #tpu.memory_space<vmem>>, vector<3072x256xbf16>
    %cst = arith.constant dense<0.000000e+00> : vector<8x256xf32>
    %2 = tpu.matmul %0, %1, %cst {dimension_numbers = #tpu.dot_dimension_numbers<[1], [0], [0], [1], [0, 0, 1, 1], [], []>} : vector<8x3072xbf16>, vector<3072x256xbf16>, vector<8x256xf32> -> vector<8x256xf32>
    %c0_3 = arith.constant 0 : index
    %c0_4 = arith.constant 0 : index
    %3 = vector.load %arg3[%c0_3, %c0_4] : memref<1x256xf32, #tpu.memory_space<vmem>>, vector<1x256xf32>
    %4 = vector.broadcast %3 : vector<1x256xf32> to vector<8x256xf32>
    %5 = arith.addf %2, %4 : vector<8x256xf32>
    %cst_5 = arith.constant 0.000000e+00 : f32
    %6 = vector.broadcast %cst_5 : f32 to vector<8x256xf32>
    %7 = arith.maximumf %5, %6 : vector<8x256xf32>
    %8 = arith.truncf %7 : vector<8x256xf32> to vector<8x256xbf16>
    %c0_6 = arith.constant 0 : index
    %c0_7 = arith.constant 0 : index
    %9 = vector.load %arg4[%c0_6, %c0_7] : memref<256x128xbf16, #tpu.memory_space<vmem>>, vector<256x128xbf16>
    %cst_8 = arith.constant dense<0.000000e+00> : vector<8x128xf32>
    %10 = tpu.matmul %8, %9, %cst_8 {dimension_numbers = #tpu.dot_dimension_numbers<[1], [0], [0], [1], [0, 0, 1, 1], [], []>} : vector<8x256xbf16>, vector<256x128xbf16>, vector<8x128xf32> -> vector<8x128xf32>
    %c0_9 = arith.constant 0 : index
    %c0_10 = arith.constant 0 : index
    %11 = vector.load %arg5[%c0_9, %c0_10] : memref<1x128xf32, #tpu.memory_space<vmem>>, vector<1x128xf32>
    %12 = vector.broadcast %11 : vector<1x128xf32> to vector<8x128xf32>
    %13 = arith.addf %10, %12 : vector<8x128xf32>
    %c0_11 = arith.constant 0 : index
    %c0_12 = arith.constant 0 : index
    %14 = vector.load %arg6[%c0_11, %c0_12] : memref<8x128xf32, #tpu.memory_space<vmem>>, vector<8x128xf32>
    tpu.vector_store %arg6[%c0_11, %c0_12], %13 {strides = array<i32>} : memref<8x128xf32, #tpu.memory_space<vmem>>, vector<8x128xf32>,
    return
  }
  func.func @transform_0(%arg0: i32) -> (i32, i32) {
    %c0_i32 = arith.constant 0 : i32
    %c0_i32_0 = arith.constant 0 : i32
    return %arg0, %c0_i32 : i32, i32
  }
  func.func @transform_1(%arg0: i32) -> (i32, i32) {
    %c0_i32 = arith.constant 0 : i32
    %c0_i32_0 = arith.constant 0 : i32
    %c0_i32_1 = arith.constant 0 : i32
    return %c0_i32, %c0_i32_0 : i32, i32
  }
  func.func @transform_2(%arg0: i32) -> (i32, i32) {
    %c0_i32 = arith.constant 0 : i32
    %c0_i32_0 = arith.constant 0 : i32
    %c0_i32_1 = arith.constant 0 : i32
    return %c0_i32, %c0_i32_0 : i32, i32
  }
  func.func @transform_3(%arg0: i32) -> (i32, i32) {
    %c0_i32 = arith.constant 0 : i32
    %c0_i32_0 = arith.constant 0 : i32
    %c0_i32_1 = arith.constant 0 : i32
    return %c0_i32, %c0_i32_0 : i32, i32
  }
  func.func @transform_4(%arg0: i32) -> (i32, i32) {
    %c0_i32 = arith.constant 0 : i32
    %c0_i32_0 = arith.constant 0 : i32
    %c0_i32_1 = arith.constant 0 : i32
    return %c0_i32, %c0_i32_0 : i32, i32
  }
  func.func @transform_5(%arg0: i32) -> (i32, i32) {
    %c0_i32 = arith.constant 0 : i32
    %c0_i32_0 = arith.constant 0 : i32
    return %arg0, %c0_i32 : i32, i32
  }
}

</mosaic_0001>

<bundles_post_ra>
// kernel: policy_forward.2
= control target key start
LH: loop header
LB: loop body
LE: loop exit
PB: predicated region body
PF: predicated region fallthrough
CT: control target
= control target key end

     0   :  { %s1734_s18 = smov 0   ;;  %s2099_s0 = inlined_call_operand.vmem [shape: bf16[2,96,512], index: 0, kind: input, shape index: {}]   ;;  %s2100_s1 = inlined_call_operand.vmem [shape: bf16[512,256], index: 1, kind: input, shape index: {}]   ;;  %s2101_s2 = inlined_call_operand.vmem [shape: f32[1,256], index: 2, kind: input, shape index: {}]   ;;  %s2102_s3 = inlined_call_operand.vmem [shape: bf16[256,32], index: 3, kind: input, shape index: {}]   ;;  %s2103_s4 = inlined_call_operand.vmem [shape: f32[1,32], index: 4, kind: input, shape index: {}]   ;;  %s2104_s5 = inlined_call_operand.vmem [shape: bf16[2,96,32], index: 5, kind: output, shape index: {}]  }
   0x1 LB: > { %s1332_s19 = sadd.s32 4294967295, %s1702_s18   ;;  %p1336_p0 = scmp.ge.s32.totalorder %s1702_s18, 1  ;;  %s1702_s18 = sphi %s1734_s18, %s15_s18  }
   0x2   : > { %p187_p1 = scmp.lt.s32.totalorder %s1702_s18, 3 }
   0x4   : > { %p188_p2 = pnand %p1336_p0, %p187_p1 }
   0x5   : > { %p215_p3 = scmp.lt.s32.totalorder (!%p188_p2), %s1332_s19, 1 }
   0x6   : > { %191 = sbr.rel (%p188_p2) target bundleno = 532 (0x214), region = 40 }
   0xb   : > { %v1548_v0 = vld [vmem:[%s2100_s1 + $0x74] ss:$8 sps:$4 sm:$0xff]   ;;  %v1552_v2 = vld [vmem:[%s2100_s1 + $0x70] ss:$8 sps:$4 sm:$0xff]   ;;  %v1554_v4 = vld [vmem:[%s2100_s1 + $0x64] ss:$8 sps:$4 sm:$0xff]  }
   0xc   : > { %v1550_v1 = vld [vmem:[%s2100_s1 + $0x174] ss:$8 sps:$4 sm:$0xff]   ;;  %766 = vmatprep.subr.bf16.mxu0 %v1548_v0  ;;  %v1553_v3 = vld [vmem:[%s2100_s1 + $0x170] ss:$8 sps:$4 sm:$0xff]   ;;  %v1556_v5 = vld [vmem:[%s2100_s1 + $0x164] ss:$8 sps:$4 sm:$0xff]  }
   0xd   : > { %859 = vmatprep.subr.bf16.mxu1 %v1550_v1  ;;  %767 = vmatpush1.bf16.msra.mxu0 %v1552_v2  ;;  %v1558_v6 = vld [vmem:[%s2100_s1 + $0x60] ss:$8 sps:$4 sm:$0xff]   ;;  %v1560_v8 = vld [vmem:[%s2100_s1 + $0x54] ss:$8 sps:$4 sm:$0xff]   ;;  %v1564_v10 = vld [vmem:[%s2100_s1 + $0x50] ss:$8 sps:$4 sm:$0xff]  }
   0xe   : > { %860 = vmatpush1.bf16.msra.mxu1 %v1553_v3  ;;  %768 = vmatprep.subr.bf16.mxu0 %v1554_v4  ;;  %v1559_v7 = vld [vmem:[%s2100_s1 + $0x160] ss:$8 sps:$4 sm:$0xff]   ;;  %v1562_v9 = vld [vmem:[%s2100_s1 + $0x154] ss:$8 sps:$4 sm:$0xff]   ;;  %v1565_v11 = vld [vmem:[%s2100_s1 + $0x150] ss:$8 sps:$4 sm:$0xff]  }
   0xf   : > { %861 = vmatprep.subr.bf16.mxu1 %v1556_v5  ;;  %v1566_v12 = vld [vmem:[%s2100_s1 + $0x44] ss:$8 sps:$4 sm:$0xff]   ;;  %v1570_v14 = vld [vmem:[%s2100_s1 + $0x40] ss:$8 sps:$4 sm:$0xff]   ;;  %v1572_v16 = vld [vmem:[%s2100_s1 + $0x34] ss:$8 sps:$4 sm:$0xff]  }
  0x10   : > { %v1568_v13 = vld [vmem:[%s2100_s1 + $0x144] ss:$8 sps:$4 sm:$0xff]   ;;  %v1571_v15 = vld [vmem:[%s2100_s1 + $0x140] ss:$8 sps:$4 sm:$0xff]   ;;  %v1574_v17 = vld [vmem:[%s2100_s1 + $0x134] ss:$8 sps:$4 sm:$0xff]  }
  0x11   : > { %769 = vmatpush1.bf16.msra.mxu0 %v1558_v6  ;;  %v1576_v18 = vld [vmem:[%s2100_s1 + $0x30] ss:$8 sps:$4 sm:$0xff]   ;;  %v1578_v20 = vld [vmem:[%s2100_s1 + $0x24] ss:$8 sps:$4 sm:$0xff]   ;;  %v1582_v22 = vld [vmem:[%s2100_s1 + $0x20] ss:$8 sps:$4 sm:$0xff]  }
  0x12   : > { %862 = vmatpush1.bf16.msra.mxu1 %v1559_v7  ;;  %770 = vmatprep.subr.bf16.mxu0 %v1560_v8  ;;  %v1577_v19 = vld [vmem:[%s2100_s1 + $0x130] ss:$8 sps:$4 sm:$0xff]   ;;  %v1580_v21 = vld [vmem:[%s2100_s1 + $0x124] ss:$8 sps:$4 sm:$0xff]   ;;  %v1583_v23 = vld [vmem:[%s2100_s1 + $0x120] ss:$8 sps:$4 sm:$0xff]  }
  0x13   : > { %863 = vmatprep.subr.bf16.mxu1 %v1562_v9  ;;  %v1584_v24 = vld [vmem:[%s2100_s1 + $0x14] ss:$8 sps:$4 sm:$0xff]   ;;  %v1588_v26 = vld [vmem:[%s2100_s1 + $0x10] ss:$8 sps:$4 sm:$0xff]   ;;  %v1590_v28 = vld [vmem:[%s2100_s1 + $0x4] ss:$8 sps:$4 sm:$0xff]  }
  0x14   : > { %v1586_v25 = vld [vmem:[%s2100_s1 + $0x114] ss:$8 sps:$4 sm:$0xff]   ;;  %v1589_v27 = vld [vmem:[%s2100_s1 + $0x110] ss:$8 sps:$4 sm:$0xff]   ;;  %v1592_v29 = vld [vmem:[%s2100_s1 + $0x104] ss:$8 sps:$4 sm:$0xff]  }
  0x15   : > { %771 = vmatpush1.bf16.msra.mxu0 %v1564_v10  ;;  %v1594_v30 = vld [vmem:[%s2100_s1] ss:$8 sps:$4 sm:$0xff]   ;;  %v1596_v32 = vld [vmem:[%s2100_s1 + $0xf4] ss:$8 sps:$4 sm:$0xff]   ;;  %v1600_v34 = vld [vmem:[%s2100_s1 + $0xf0] ss:$8 sps:$4 sm:$0xff]  }
  0x16   : > { %864 = vmatpush1.bf16.msra.mxu1 %v1565_v11  ;;  %772 = vmatprep.subr.bf16.mxu0 %v1566_v12  ;;  %v1595_v31 = vld [vmem:[%s2100_s1 + $0x100] ss:$8 sps:$4 sm:$0xff]   ;;  %v1598_v33 = vld [vmem:[%s2100_s1 + $0x1f4] ss:$8 sps:$4 sm:$0xff]   ;;  %v1601_v35 = vld [vmem:[%s2100_s1 + $0x1f0] ss:$8 sps:$4 sm:$0xff]  }
  0x17   : > { %865 = vmatprep.subr.bf16.mxu1 %v1568_v13  ;;  %v1602_v36 = vld [vmem:[%s2100_s1 + $0xe4] ss:$8 sps:$4 sm:$0xff]   ;;  %s2106_s19 = smov (!%p215_p3, %s1332_s19), 1  ;;  %v1606_v38 = vld [vmem:[%s2100_s1 + $0xe0] ss:$8 sps:$4 sm:$0xff]   ;;  %v1680_v3 = vld [vmem:[%s2102_s3 + $0x78] sm:$0xff]  }
  0x18   : > { %v1604_v37 = vld [vmem:[%s2100_s1 + $0x1e4] ss:$8 sps:$4 sm:$0xff]   ;;  %v1607_v39 = vld [vmem:[%s2100_s1 + $0x1e0] ss:$8 sps:$4 sm:$0xff]   ;;  %v1608_v40 = vld [vmem:[%s2100_s1 + $0xd4] ss:$8 sps:$4 sm:$0xff]  }
  0x19   : > { %773 = vmatpush1.bf16.msra.mxu0 %v1570_v14  ;;  %s1538_s8 = smul.u32 192, %s2106_s19  ;;  %v1610_v41 = vld [vmem:[%s2100_s1 + $0x1d4] ss:$8 sps:$4 sm:$0xff]   ;;  %v1612_v42 = vld [vmem:[%s2100_s1 + $0xd0] ss:$8 sps:$4 sm:$0xff]   ;;  %v1684_v10 = vld [vmem:[%s2102_s3 + $0x68] sm:$0xff]  }
  0x1a   : > { %866 = vmatpush1.bf16.msra.mxu1 %v1571_v15  ;;  %774 = vmatprep.subr.bf16.mxu0 %v1572_v16  ;;  %v1613_v43 = vld [vmem:[%s2100_s1 + $0x1d0] ss:$8 sps:$4 sm:$0xff]   ;;  %v1614_v44 = vld [vmem:[%s2100_s1 + $0xc4] ss:$8 sps:$4 sm:$0xff]   ;;  %v1618_v46 = vld [vmem:[%s2100_s1 + $0xc0] ss:$8 sps:$4 sm:$0xff]  }
  0x1b   : > { %867 = vmatprep.subr.bf16.mxu1 %v1574_v17  ;;  %s1887_s21 = scalar_lea.vmem %s2099_s0, %s1538_s8  ;;  %v1616_v45 = vld [vmem:[%s2100_s1 + $0x1c4] ss:$8 sps:$4 sm:$0xff]   ;;  %v1619_v47 = vld [vmem:[%s2100_s1 + $0x1c0] ss:$8 sps:$4 sm:$0xff]   ;;  %v1620_v48 = vld [vmem:[%s2100_s1 + $0xb4] ss:$8 sps:$4 sm:$0xff]  }
  0x1c   : > { %v1646_v49 = vld [vmem:[%s1887_s21 + $0x4] ss:$16 sps:$4 sm:$0xff]   ;;  %v1649_v51 = vld [vmem:[%s1887_s21 + $0xc] ss:$16 sps:$4 sm:$0xff]   ;;  %v1624_v52 = vld [vmem:[%s2100_s1 + $0xb0] ss:$8 sps:$4 sm:$0xff]  }
  0x1d   : > { %775 = vmatpush1.bf16.msra.mxu0 %v1576_v18  ;;  %v1622_v50 = vld [vmem:[%s2100_s1 + $0x1b4] ss:$8 sps:$4 sm:$0xff]   ;;  %798 = vmatprep.mubr.bf16.mxu0 %v1646_v49  ;;  %v1625_v53 = vld [vmem:[%s2100_s1 + $0x1b0] ss:$8 sps:$4 sm:$0xff]   ;;  %v1626_v54 = vld [vmem:[%s2100_s1 + $0xa4] ss:$8 sps:$4 sm:$0xff]  }
  0x1e   : > { %868 = vmatpush1.bf16.msra.mxu1 %v1577_v19  ;;  %776 = vmatprep.subr.bf16.mxu0 %v1578_v20  ;;  %v1628_v55 = vld [vmem:[%s2100_s1 + $0x1a4] ss:$8 sps:$4 sm:$0xff]   ;;  %v1630_v56 = vld [vmem:[%s2100_s1 + $0xa0] ss:$8 sps:$4 sm:$0xff]   ;;  %v1632_v58 = vld [vmem:[%s2100_s1 + $0x94] ss:$8 sps:$4 sm:$0xff]  }
  0x1f   : > { %869 = vmatprep.subr.bf16.mxu1 %v1580_v21  ;;  %891 = vmatprep.mubr.bf16.mxu1 %v1649_v51  ;;  %v1631_v57 = vld [vmem:[%s2100_s1 + $0x1a0] ss:$8 sps:$4 sm:$0xff]   ;;  %v1634_v59 = vld [vmem:[%s2100_s1 + $0x194] ss:$8 sps:$4 sm:$0xff]   ;;  %v1636_v60 = vld [vmem:[%s2100_s1 + $0x90] ss:$8 sps:$4 sm:$0xff]  }
  0x20   : > { %v1637_v61 = vld [vmem:[%s2100_s1 + $0x190] ss:$8 sps:$4 sm:$0xff]   ;;  %v1638_v62 = vld [vmem:[%s2100_s1 + $0x84] ss:$8 sps:$4 sm:$0xff]   ;;  %v1642_v0 = vld [vmem:[%s2100_s1 + $0x80] ss:$8 sps:$4 sm:$0xff]  }
  0x21   : > { %777 = vmatpush1.bf16.msra.mxu0 %v1582_v22  ;;  %v1640_v63 = vld [vmem:[%s2100_s1 + $0x184] ss:$8 sps:$4 sm:$0xff]   ;;  %v1643_v1 = vld [vmem:[%s2100_s1 + $0x180] ss:$8 sps:$4 sm:$0xff]   ;;  %v1681_v7 = vld [vmem:[%s2102_s3 + $0x38] sm:$0xff]   ;;  %s1539_s29 = smul.u32 48, %s2106_s19 }
  0x22   : > { %870 = vmatpush1.bf16.msra.mxu1 %v1583_v23  ;;  %778 = vmatprep.subr.bf16.mxu0 %v1584_v24  ;;  %v1644_v2 = vld [vmem:[%s1887_s21] ss:$16 sps:$4 sm:$0xff]   ;;  %v1647_v4 = vld [vmem:[%s1887_s21 + $0x8] ss:$16 sps:$4 sm:$0xff]   ;;  %v1650_v5 = vld [vmem:[%s1887_s21 + $0x24] ss:$16 sps:$4 sm:$0xff]  }
  0x23   : > { %871 = vmatprep.subr.bf16.mxu1 %v1586_v25  ;;  %v1652_v6 = vld [vmem:[%s1887_s21 + $0x2c] ss:$16 sps:$4 sm:$0xff]   ;;  %v1682_v8 = vld [vmem:[%s2102_s3 + $0x70] sm:$0xff]   ;;  %v1655_v12 = vld [vmem:[%s1887_s21 + $0x28] ss:$16 sps:$4 sm:$0xff]   ;;  %s2059_s7 = scalar_lea.vmem %s2104_s5, %s1539_s29  ;;  %vm1264_vm0 = vcmask 257024  }
  0x24   : > { %v1683_v9 = vld [vmem:[%s2102_s3 + $0x30] sm:$0xff]   ;;  %v1658_v14 = vld [vmem:[%s1887_s21 + $0x4c] ss:$16 sps:$4 sm:$0xff]   ;;  %v1686_v16 = vld [vmem:[%s2102_s3 + $0x60] sm:$0xff]  }
  0x25   : > { %779 = vmatpush1.bf16.msra.mxu0 %v1588_v26  ;;  %v1654_v11 = vld [vmem:[%s1887_s21 + $0x20] ss:$16 sps:$4 sm:$0xff]   ;;  %v1656_v13 = vld [vmem:[%s1887_s21 + $0x44] ss:$16 sps:$4 sm:$0xff]   ;;  %v1685_v15 = vld [vmem:[%s2102_s3 + $0x28] sm:$0xff]  }
  0x26   : > { %872 = vmatpush1.bf16.msra.mxu1 %v1589_v27  ;;  %780 = vmatprep.subr.bf16.mxu0 %v1590_v28  ;;  %v1687_v17 = vld [vmem:[%s2102_s3 + $0x20] sm:$0xff]   ;;  %v1661_v19 = vld [vmem:[%s1887_s21 + $0x48] ss:$16 sps:$4 sm:$0xff]   ;;  %v1664_v21 = vld [vmem:[%s1887_s21 + $0x6c] ss:$16 sps:$4 sm:$0xff]  }
  0x27   : > { %873 = vmatprep.subr.bf16.mxu1 %v1592_v29  ;;  %v1660_v18 = vld [vmem:[%s1887_s21 + $0x40] ss:$16 sps:$4 sm:$0xff]   ;;  %v1662_v20 = vld [vmem:[%s1887_s21 + $0x64] ss:$16 sps:$4 sm:$0xff]   ;;  %v1667_v23 = vld [vmem:[%s1887_s21 + $0x68] ss:$16 sps:$4 sm:$0xff]  }
  0x28   : > { %v1666_v22 = vld [vmem:[%s1887_s21 + $0x60] ss:$16 sps:$4 sm:$0xff]   ;;  %v1668_v24 = vld [vmem:[%s1887_s21 + $0x84] ss:$16 sps:$4 sm:$0xff]   ;;  %v1670_v25 = vld [vmem:[%s1887_s21 + $0x8c] ss:$16 sps:$4 sm:$0xff]  }
  0x29   : > { %781 = vmatpush1.bf16.msra.mxu0 %v1594_v30  ;;  %v1672_v26 = vld [vmem:[%s1887_s21 + $0x80] ss:$16 sps:$4 sm:$0xff]   ;;  %v1673_v27 = vld [vmem:[%s1887_s21 + $0x88] ss:$16 sps:$4 sm:$0xff]   ;;  %v1674_v28 = vld [vmem:[%s1887_s21 + $0xa4] ss:$16 sps:$4 sm:$0xff]  }
  0x2a   : > { %874 = vmatpush1.bf16.msra.mxu1 %v1595_v31  ;;  %782 = vmatprep.subr.bf16.mxu0 %v1596_v32  ;;  %v1676_v29 = vld [vmem:[%s1887_s21 + $0xac] ss:$16 sps:$4 sm:$0xff]   ;;  %v1678_v30 = vld [vmem:[%s1887_s21 + $0xa0] ss:$16 sps:$4 sm:$0xff]   ;;  %v1679_v31 = vld [vmem:[%s1887_s21 + $0xa8] ss:$16 sps:$4 sm:$0xff]  }
  0x2b   : > { %875 = vmatprep.subr.bf16.mxu1 %v1598_v33  ;;  %v1688_v32 = vld [vmem:[%s2102_s3 + $0x58] sm:$0xff]  }
  0x2c   : > { %v1689_v33 = vld [vmem:[%s2102_s3 + $0x18] sm:$0xff]  }
  0x2d   : > { %783 = vmatpush2.bf16.msra.mxu0 %v1600_v34  ;;  %v1690_v34 = vld [vmem:[%s2102_s3 + $0x50] sm:$0xff]  }
  0x2e   : > { %876 = vmatpush2.bf16.msra.mxu1 %v1601_v35  ;;  %784 = vmatprep.subr.bf16.mxu0 %v1602_v36  ;;  %v1691_v35 = vld [vmem:[%s2102_s3 + $0x10] sm:$0xff]   ;;  %v1692_v36 = vld [vmem:[%s2102_s3 + $0x48] sm:$0xff]  }
  0x2f   : > { %877 = vmatprep.subr.bf16.mxu1 %v1604_v37  ;;  %v1693_v37 = vld [vmem:[%s2102_s3 + $0x8] sm:$0xff]  }
  0x31   : > { %785 = vmatpush2.bf16.msra.mxu0 %v1606_v38  ;;  %v1694_v38 = vld [vmem:[%s2102_s3 + $0x40] sm:$0xff]  }
  0x32   : > { %878 = vmatpush2.bf16.msra.mxu1 %v1607_v39  ;;  %786 = vmatprep.subr.bf16.mxu0 %v1608_v40  ;;  %v1695_v39 = vld [vmem:[%s2102_s3] sm:$0xff]   ;;  %v316_v40 = vlaneseq }
  0x33   : > { %879 = vmatprep.subr.bf16.mxu1 %v1610_v41 }
  0x34   : > { %v317_v41 = vshrl.u32 %v316_v40, 7 }
  0x35   : > { %787 = vmatpush2.bf16.msra.mxu0 %v1612_v42 }
  0x36   : > { %880 = vmatpush2.bf16.msra.mxu1 %v1613_v43  ;;  %788 = vmatprep.subr.bf16.mxu0 %v1614_v44  ;;  %v322_v42 = vsub.s32 1, %v317_v41  ;;  %v318_v43 = vsub.s32 0, %v317_v41  ;;  %v314_v44 = vld [vmem:[%s2101_s2] sm:$0x3] }
  0x37   : > { %881 = vmatprep.subr.bf16.mxu1 %v1616_v45 }
  0x38   : > { %v2021_v45 = vrot.slane %v314_v44, %v322_v42 }
  0x39   : > { %789 = vmatpush2.bf16.msra.mxu0 %v1618_v46  ;;  %v2023_v46 = vrot.slane %v314_v44, %v318_v43 }
  0x3a   : > { %882 = vmatpush2.bf16.msra.mxu1 %v1619_v47  ;;  %790 = vmatprep.subr.bf16.mxu0 %v1620_v48 }
  0x3b   : > { %883 = vmatprep.subr.bf16.mxu1 %v1622_v50 }
  0x3d   : > { %791 = vmatpush2.bf16.msra.mxu0 %v1624_v52 }
  0x3e   : > { %884 = vmatpush2.bf16.msra.mxu1 %v1625_v53  ;;  %792 = vmatprep.subr.bf16.mxu0 %v1626_v54 }
  0x3f   : > { %885 = vmatprep.subr.bf16.mxu1 %v1628_v55 }
  0x41   : > { %793 = vmatpush2.bf16.msra.mxu0 %v1630_v56 }
  0x42   : > { %886 = vmatpush2.bf16.msra.mxu1 %v1631_v57  ;;  %794 = vmatprep.subr.bf16.mxu0 %v1632_v58 }
  0x43   : > { %887 = vmatprep.subr.bf16.mxu1 %v1634_v59 }
  0x45   : > { %795 = vmatpush2.bf16.msra.mxu0 %v1636_v60 }
  0x46   : > { %888 = vmatpush2.bf16.msra.mxu1 %v1637_v61  ;;  %796 = vmatprep.subr.bf16.mxu0 %v1638_v62 }
  0x47   : > { %889 = vmatprep.subr.bf16.mxu1 %v1640_v63 }
  0x49   : > { %797 = vmatpush2.bf16.msra.mxu0 %v1642_v0 }
  0x4a   : > { %890 = vmatpush2.bf16.msra.mxu1 %v1643_v1  ;;  %1470 = vmatprep.subr.bf16.mxu0 %v1680_v3 }
  0x4b   : > { %1522 = vmatprep.subr.bf16.mxu1 %v1680_v3 }
  0x4c   : > { %799 = vmatmul.mubr.bf16.vlgmr.msra.gmra.mxu0 %v1644_v2 }
  0x4d   : > { %892 = vmatmul.mubr.bf16.vlgmr.msra.gmra.mxu1 %v1647_v4  ;;  %808 = vmatprep.mubr.bf16.mxu0 %v1650_v5 }
  0x4e   : > { %901 = vmatprep.mubr.bf16.mxu1 %v1652_v6  ;;  %1471 = vmatpush3.bf16.msra.mxu0 %v1681_v7 }
  0x4f   : > { %1530 = vmatpush3.bf16.msra.mxu1 %v1681_v7  ;;  %1472 = vmatprep.subr.bf16.mxu0 %v1682_v8 }
  0x50   : > { %1523 = vmatprep.subr.bf16.mxu1 %v1682_v8 }
  0x52   : > { %1473 = vmatpush3.bf16.msra.mxu0 %v1683_v9 }
  0x53   : > { %1531 = vmatpush3.bf16.msra.mxu1 %v1683_v9  ;;  %1474 = vmatprep.subr.bf16.mxu0 %v1684_v10 }
  0x54   : > { %1524 = vmatprep.subr.bf16.mxu1 %v1684_v10  ;;  %809 = vmatmul.mubr.bf16.gmra.mxu0 %v1654_v11 }
  0x55   : > { %902 = vmatmul.mubr.bf16.gmra.mxu1 %v1655_v12  ;;  %818 = vmatprep.mubr.bf16.mxu0 %v1656_v13 }
  0x56   : > { %911 = vmatprep.mubr.bf16.mxu1 %v1658_v14  ;;  %1475 = vmatpush3.bf16.msra.mxu0 %v1685_v15 }
  0x57   : > { %1532 = vmatpush3.bf16.msra.mxu1 %v1685_v15  ;;  %1476 = vmatprep.subr.bf16.mxu0 %v1686_v16 }
  0x58   : > { %1525 = vmatprep.subr.bf16.mxu1 %v1686_v16 }
  0x5a   : > { %1477 = vmatpush3.bf16.msra.mxu0 %v1687_v17 }
  0x5b   : > { %1533 = vmatpush3.bf16.msra.mxu1 %v1687_v17  ;;  %1478 = vmatprep.subr.bf16.mxu0 %v1688_v32 }
  0x5c   : > { %819 = vmatmul.mubr.bf16.gmra.mxu0 %v1660_v18  ;;  %1526 = vmatprep.subr.bf16.mxu1 %v1688_v32 }
  0x5d   : > { %912 = vmatmul.mubr.bf16.gmra.mxu1 %v1661_v19  ;;  %828 = vmatprep.mubr.bf16.mxu0 %v1662_v20 }
  0x5e   : > { %921 = vmatprep.mubr.bf16.mxu1 %v1664_v21  ;;  %1479 = vmatpush3.bf16.msra.mxu0 %v1689_v33 }
  0x5f   : > { %1534 = vmatpush3.bf16.msra.mxu1 %v1689_v33  ;;  %1480 = vmatprep.subr.bf16.mxu0 %v1690_v34 }
  0x60   : > { %1527 = vmatprep.subr.bf16.mxu1 %v1690_v34 }
  0x62   : > { %1481 = vmatpush3.bf16.msra.mxu0 %v1691_v35 }
  0x63   : > { %1535 = vmatpush3.bf16.msra.mxu1 %v1691_v35  ;;  %1482 = vmatprep.subr.bf16.mxu0 %v1692_v36 }
  0x64   : > { %829 = vmatmul.mubr.bf16.gmra.mxu0 %v1666_v22  ;;  %1528 = vmatprep.subr.bf16.mxu1 %v1692_v36 }
  0x65   : > { %922 = vmatmul.mubr.bf16.gmra.mxu1 %v1667_v23  ;;  %838 = vmatprep.mubr.bf16.mxu0 %v1668_v24 }
  0x66   : > { %931 = vmatprep.mubr.bf16.mxu1 %v1670_v25  ;;  %1483 = vmatpush3.bf16.msra.mxu0 %v1693_v37 }
  0x67   : > { %1536 = vmatpush3.bf16.msra.mxu1 %v1693_v37  ;;  %1484 = vmatprep.subr.bf16.mxu0 %v1694_v38 }
  0x68   : > { %1529 = vmatprep.subr.bf16.mxu1 %v1694_v38 }
  0x6a   : > { %1485 = vmatpush3.bf16.msra.mxu0 %v1695_v39 }
  0x6b   : > { %1537 = vmatpush3.bf16.msra.mxu1 %v1695_v39 }
  0x6c   : > { %839 = vmatmul.mubr.bf16.gmra.mxu0 %v1672_v26 }
  0x6d   : > { %932 = vmatmul.mubr.bf16.gmra.mxu1 %v1673_v27  ;;  %848 = vmatprep.mubr.bf16.mxu0 %v1674_v28 }
  0x6e   : > { %941 = vmatprep.mubr.bf16.mxu1 %v1676_v29 }
  0x74   : > { %849 = vmatmul.mubr.bf16.gmra.mxu0 %v1678_v30 }
  0x75   : > { %942 = vmatmul.mubr.bf16.gmra.mxu1 %v1679_v31 }
 0x10c   : > { %v800_v47 = vpop.f32.mrf.mxu0 }
 0x10d   : > { %v893_v48 = vpop.f32.mrf.mxu1  ;;  %v801_v52 = vadd.f32 %v800_v47, %v2023_v46 }
 0x10e   : > { %v802_v49 = vpop.f32.mrf.mxu0 }
 0x10f   : > { %v895_v50 = vpop.f32.mrf.mxu1  ;;  %v803_v51 = vadd.f32 %v802_v49, %v2021_v45  ;;  %v894_v61 = vadd.f32 %v893_v48, %v801_v52 }
 0x110   : > { %v804_v53 = vpop.f32.mrf.mxu0 }
 0x111   : > { %v897_v54 = vpop.f32.mrf.mxu1  ;;  %v805_v55 = vadd.f32 %v804_v53, %v2023_v46  ;;  %v896_v58 = vadd.f32 %v895_v50, %v803_v51  ;;  %v952_v7 = vmax.f32 %v894_v61, 0.0 }
 0x112   : > { %v806_v56 = vpop.f32.mrf.mxu0 }
 0x113   : > { %v899_v57 = vpop.f32.mrf.mxu1  ;;  %v898_v59 = vadd.f32 %v897_v54, %v805_v55  ;;  %v807_v60 = vadd.f32 %v806_v56, %v2021_v45  ;;  %v953_v4 = vmax.f32 %v896_v58, 0.0 }
 0x114   : > { %v810_v62 = vpop.f32.mrf.mxu0 }
 0x115   : > { %v903_v63 = vpop.f32.mrf.mxu1  ;;  %v900_v0 = vadd.f32 %v899_v57, %v807_v60  ;;  %v954_v1 = vmax.f32 %v898_v59, 0.0  ;;  %v811_v8 = vadd.f32 %v810_v62, %v2023_v46 }
 0x116   : > { %v812_v2 = vpop.f32.mrf.mxu0 }
 0x117   : > { %v905_v3 = vpop.f32.mrf.mxu1  ;;  %v955_v5 = vmax.f32 %v900_v0, 0.0  ;;  %v813_v6 = vadd.f32 %v812_v2, %v2021_v45  ;;  %v976_v13 = vpack.c.bf16 %v954_v1, %v952_v7  ;;  %v904_v19 = vadd.f32 %v903_v63, %v811_v8 }
 0x118   : > { %v814_v9 = vpop.f32.mrf.mxu0 }
 0x119   : > { %v907_v10 = vpop.f32.mrf.mxu1  ;;  %v977_v11 = vpack.c.bf16 %v955_v5, %v953_v4  ;;  %v815_v12 = vadd.f32 %v814_v9, %v2023_v46  ;;  %v906_v16 = vadd.f32 %v905_v3, %v813_v6  ;;  %v956_v29 = vmax.f32 %v904_v19, 0.0 }
 0x11a   : > { %v816_v14 = vpop.f32.mrf.mxu0 }
 0x11b   : > { %v909_v15 = vpop.f32.mrf.mxu1  ;;  %v908_v17 = vadd.f32 %v907_v10, %v815_v12  ;;  %v817_v18 = vadd.f32 %v816_v14, %v2021_v45  ;;  %1155 = vmatprep.mubr.bf16.mxu0 %v977_v11  ;;  %v957_v26 = vmax.f32 %v906_v16, 0.0 }
 0x11c   : > { %v820_v20 = vpop.f32.mrf.mxu0  ;;  %1156 = vmatmul.mubr.bf16.vlgmr.msra.gmra.mxu0 %v976_v13 }
 0x11d   : > { %v913_v21 = vpop.f32.mrf.mxu1  ;;  %v910_v22 = vadd.f32 %v909_v15, %v817_v18  ;;  %v958_v23 = vmax.f32 %v908_v17, 0.0  ;;  %v821_v30 = vadd.f32 %v820_v20, %v2023_v46 }
 0x11e   : > { %v822_v24 = vpop.f32.mrf.mxu0 }
 0x11f   : > { %v915_v25 = vpop.f32.mrf.mxu1  ;;  %v959_v27 = vmax.f32 %v910_v22, 0.0  ;;  %v823_v28 = vadd.f32 %v822_v24, %v2021_v45  ;;  %v978_v35 = vpack.c.bf16 %v958_v23, %v956_v29  ;;  %v914_v41 = vadd.f32 %v913_v21, %v821_v30 }
 0x120   : > { %v824_v31 = vpop.f32.mrf.mxu0 }
 0x121   : > { %v917_v32 = vpop.f32.mrf.mxu1  ;;  %v979_v33 = vpack.c.bf16 %v959_v27, %v957_v26  ;;  %v825_v34 = vadd.f32 %v824_v31, %v2023_v46  ;;  %v916_v38 = vadd.f32 %v915_v25, %v823_v28  ;;  %v960_v53 = vmax.f32 %v914_v41, 0.0 }
 0x122   : > { %v826_v36 = vpop.f32.mrf.mxu0 }
 0x123   : > { %v919_v37 = vpop.f32.mrf.mxu1  ;;  %v918_v39 = vadd.f32 %v917_v32, %v825_v34  ;;  %v827_v40 = vadd.f32 %v826_v36, %v2021_v45  ;;  %1163 = vmatprep.mubr.bf16.mxu0 %v979_v33  ;;  %v961_v50 = vmax.f32 %v916_v38, 0.0 }
 0x124   : > { %v830_v42 = vpop.f32.mrf.mxu0  ;;  %1164 = vmatmul.mubr.bf16.gmra.mxu0 %v978_v35 }
 0x125   : > { %v923_v43 = vpop.f32.mrf.mxu1  ;;  %v920_v44 = vadd.f32 %v919_v37, %v827_v40  ;;  %v962_v47 = vmax.f32 %v918_v39, 0.0  ;;  %v831_v54 = vadd.f32 %v830_v42, %v2023_v46 }
 0x126   : > { %v832_v48 = vpop.f32.mrf.mxu0 }
 0x127   : > { %v925_v49 = vpop.f32.mrf.mxu1  ;;  %v963_v51 = vmax.f32 %v920_v44, 0.0  ;;  %v833_v52 = vadd.f32 %v832_v48, %v2021_v45  ;;  %v980_v59 = vpack.c.bf16 %v962_v47, %v960_v53  ;;  %v924_v1 = vadd.f32 %v923_v43, %v831_v54 }
 0x128   : > { %v834_v55 = vpop.f32.mrf.mxu0 }
 0x129   : > { %v927_v56 = vpop.f32.mrf.mxu1  ;;  %v981_v57 = vpack.c.bf16 %v963_v51, %v961_v50  ;;  %v835_v58 = vadd.f32 %v834_v55, %v2023_v46  ;;  %v926_v62 = vadd.f32 %v925_v49, %v833_v52  ;;  %v964_v11 = vmax.f32 %v924_v1, 0.0  ;;  %v2052_v55 = vld [vmem:[%s2103_s4] ss:$0 sm:$0xff] }
 0x12a   : > { %v836_v60 = vpop.f32.mrf.mxu0 }
 0x12b   : > { %v929_v61 = vpop.f32.mrf.mxu1  ;;  %v928_v63 = vadd.f32 %v927_v56, %v835_v58  ;;  %v837_v0 = vadd.f32 %v836_v60, %v2021_v45  ;;  %1171 = vmatprep.mubr.bf16.mxu0 %v981_v57  ;;  %v965_v8 = vmax.f32 %v926_v62, 0.0 }
 0x12c   : > { %v840_v2 = vpop.f32.mrf.mxu0  ;;  %1172 = vmatmul.mubr.bf16.gmra.mxu0 %v980_v59 }
 0x12d   : > { %v933_v3 = vpop.f32.mrf.mxu1  ;;  %v930_v4 = vadd.f32 %v929_v61, %v837_v0  ;;  %v966_v5 = vmax.f32 %v928_v63, 0.0  ;;  %v841_v12 = vadd.f32 %v840_v2, %v2023_v46 }
 0x12e   : > { %v842_v6 = vpop.f32.mrf.mxu0 }
 0x12f   : > { %v935_v7 = vpop.f32.mrf.mxu1  ;;  %v967_v9 = vmax.f32 %v930_v4, 0.0  ;;  %v843_v10 = vadd.f32 %v842_v6, %v2021_v45  ;;  %v982_v17 = vpack.c.bf16 %v966_v5, %v964_v11  ;;  %v934_v23 = vadd.f32 %v933_v3, %v841_v12 }
 0x130   : > { %v844_v13 = vpop.f32.mrf.mxu0 }
 0x131   : > { %v937_v14 = vpop.f32.mrf.mxu1  ;;  %v983_v15 = vpack.c.bf16 %v967_v9, %v965_v8  ;;  %v845_v16 = vadd.f32 %v844_v13, %v2023_v46  ;;  %v936_v20 = vadd.f32 %v935_v7, %v843_v10  ;;  %v968_v33 = vmax.f32 %v934_v23, 0.0 }
 0x132   : > { %v846_v18 = vpop.f32.mrf.mxu0 }
 0x133   : > { %v939_v19 = vpop.f32.mrf.mxu1  ;;  %v938_v21 = vadd.f32 %v937_v14, %v845_v16  ;;  %v847_v22 = vadd.f32 %v846_v18, %v2021_v45  ;;  %1179 = vmatprep.mubr.bf16.mxu1 %v983_v15  ;;  %v969_v30 = vmax.f32 %v936_v20, 0.0 }
 0x134   : > { %v850_v24 = vpop.f32.mrf.mxu0  ;;  %1180 = vmatmul.mubr.bf16.vlgmr.msra.gmra.mxu1 %v982_v17 }
 0x135   : > { %v943_v25 = vpop.f32.mrf.mxu1  ;;  %v940_v26 = vadd.f32 %v939_v19, %v847_v22  ;;  %v970_v27 = vmax.f32 %v938_v21, 0.0  ;;  %v851_v34 = vadd.f32 %v850_v24, %v2023_v46 }
 0x136   : > { %v852_v28 = vpop.f32.mrf.mxu0 }
 0x137   : > { %v945_v29 = vpop.f32.mrf.mxu1  ;;  %v971_v31 = vmax.f32 %v940_v26, 0.0  ;;  %v853_v32 = vadd.f32 %v852_v28, %v2021_v45  ;;  %v984_v39 = vpack.c.bf16 %v970_v27, %v968_v33  ;;  %v944_v44 = vadd.f32 %v943_v25, %v851_v34 }
 0x138   : > { %v854_v35 = vpop.f32.mrf.mxu0 }
 0x139   : > { %v947_v36 = vpop.f32.mrf.mxu1  ;;  %v985_v37 = vpack.c.bf16 %v971_v31, %v969_v30  ;;  %v855_v38 = vadd.f32 %v854_v35, %v2023_v46  ;;  %v946_v41 = vadd.f32 %v945_v29, %v853_v32  ;;  %v972_v52 = vmax.f32 %v944_v44, 0.0 }
 0x13a   : > { %v856_v40 = vpop.f32.mrf.mxu0 }
 0x13b   : > { %v948_v42 = vadd.f32 %v947_v36, %v855_v38  ;;  %v857_v43 = vadd.f32 %v856_v40, %v2021_v45  ;;  %1187 = vmatprep.mubr.bf16.mxu1 %v985_v37  ;;  %v949_v47 = vpop.f32.mrf.mxu1  ;;  %v973_v50 = vmax.f32 %v946_v41, 0.0 }
 0x13c   : > { %1188 = vmatmul.mubr.bf16.gmra.mxu1 %v984_v39 }
 0x13d   : > { %v950_v48 = vadd.f32 %v949_v47, %v857_v43  ;;  %v974_v49 = vmax.f32 %v948_v42, 0.0 }
 0x13f   : > { %v975_v51 = vmax.f32 %v950_v48, 0.0  ;;  %v986_v54 = vpack.c.bf16 %v974_v49, %v972_v52 }
 0x141   : > { %v987_v53 = vpack.c.bf16 %v975_v51, %v973_v50 }
 0x143   : > { %1195 = vmatprep.mubr.bf16.mxu1 %v987_v53 }
 0x144   : > { %1196 = vmatmul.mubr.bf16.gmra.mxu1 %v986_v54 }
 0x1dc   : > { %v1486_v46 = vpop.f32.mrf.mxu0 }
 0x1de   : > { %v1487_v45 = vpop.f32.mrf.mxu0 }
 0x1df   : > { %v1488_v56 = vadd.f32 %v1487_v45, %v1486_v46 }
 0x1e0   : > { %v1489_v57 = vpop.f32.mrf.mxu0 }
 0x1e1   : > { %v1158_v58 = vadd.f32 %v1488_v56, %v2052_v55 }
 0x1e2   : > { %v1490_v59 = vpop.f32.mrf.mxu0 }
 0x1e3   : > { %v1204_v60 = vmax.f32 %v1158_v58, 0.0  ;;  %v1491_v61 = vadd.f32 %v1490_v59, %v1489_v57 }
 0x1e4   : > { %v1492_v62 = vpop.f32.mrf.mxu0 }
 0x1e5   : > { %v1458_v63 = vpack.c.bf16 %v1204_v60, %v1204_v60  ;;  %v1161_v0 = vadd.f32 %v1491_v61, %v2052_v55 }
 0x1e6   : > { %v1493_v1 = vpop.f32.mrf.mxu0 }
 0x1e7   : > { %1265 = vst.msk [vmem:[%s2059_s7] sm:$0xf] %vm1264_vm0, %v1458_v63  ;;  %v1205_v2 = vmax.f32 %v1161_v0, 0.0  ;;  %v1494_v3 = vadd.f32 %v1493_v1, %v1492_v62 }
 0x1e8   : > { %v1495_v4 = vpop.f32.mrf.mxu0 }
 0x1e9   : > { %v1459_v5 = vpack.c.bf16 %v1205_v2, %v1205_v2  ;;  %v1166_v6 = vadd.f32 %v1494_v3, %v2052_v55 }
 0x1ea   : > { %v1496_v7 = vpop.f32.mrf.mxu0 }
 0x1eb   : > { %1266 = vst.msk [vmem:[%s2059_s7 + $0x4] sm:$0xf] %vm1264_vm0, %v1459_v5  ;;  %v1206_v8 = vmax.f32 %v1166_v6, 0.0  ;;  %v1497_v9 = vadd.f32 %v1496_v7, %v1495_v4 }
 0x1ec   : > { %v1498_v10 = vpop.f32.mrf.mxu0 }
 0x1ed   : > { %v1460_v11 = vpack.c.bf16 %v1206_v8, %v1206_v8  ;;  %v1169_v12 = vadd.f32 %v1497_v9, %v2052_v55 }
 0x1ee   : > { %v1499_v13 = vpop.f32.mrf.mxu0 }
 0x1ef   : > { %1267 = vst.msk [vmem:[%s2059_s7 + $0x8] sm:$0xf] %vm1264_vm0, %v1460_v11  ;;  %v1207_v14 = vmax.f32 %v1169_v12, 0.0  ;;  %v1500_v15 = vadd.f32 %v1499_v13, %v1498_v10 }
 0x1f0   : > { %v1501_v16 = vpop.f32.mrf.mxu0 }
 0x1f1   : > { %v1461_v17 = vpack.c.bf16 %v1207_v14, %v1207_v14  ;;  %v1174_v18 = vadd.f32 %v1500_v15, %v2052_v55 }
 0x1f2   : > { %v1502_v19 = vpop.f32.mrf.mxu0 }
 0x1f3   : > { %1268 = vst.msk [vmem:[%s2059_s7 + $0xc] sm:$0xf] %vm1264_vm0, %v1461_v17  ;;  %v1208_v20 = vmax.f32 %v1174_v18, 0.0  ;;  %v1503_v21 = vadd.f32 %v1502_v19, %v1501_v16 }
 0x1f4   : > { %v1504_v22 = vpop.f32.mrf.mxu1 }
 0x1f5   : > { %v1462_v23 = vpack.c.bf16 %v1208_v20, %v1208_v20  ;;  %v1177_v24 = vadd.f32 %v1503_v21, %v2052_v55 }
 0x1f6   : > { %v1505_v25 = vpop.f32.mrf.mxu1 }
 0x1f7   : > { %1269 = vst.msk [vmem:[%s2059_s7 + $0x10] sm:$0xf] %vm1264_vm0, %v1462_v23  ;;  %v1209_v26 = vmax.f32 %v1177_v24, 0.0  ;;  %v1506_v27 = vadd.f32 %v1505_v25, %v1504_v22 }
 0x1f8   : > { %v1507_v28 = vpop.f32.mrf.mxu1 }
 0x1f9   : > { %v1463_v29 = vpack.c.bf16 %v1209_v26, %v1209_v26  ;;  %v1182_v30 = vadd.f32 %v1506_v27, %v2052_v55 }
 0x1fa   : > { %v1508_v31 = vpop.f32.mrf.mxu1 }
 0x1fb   : > { %1270 = vst.msk [vmem:[%s2059_s7 + $0x14] sm:$0xf] %vm1264_vm0, %v1463_v29  ;;  %v1210_v32 = vmax.f32 %v1182_v30, 0.0  ;;  %v1509_v33 = vadd.f32 %v1508_v31, %v1507_v28 }
 0x1fc   : > { %v1510_v34 = vpop.f32.mrf.mxu1 }
 0x1fd   : > { %v1464_v35 = vpack.c.bf16 %v1210_v32, %v1210_v32  ;;  %v1185_v36 = vadd.f32 %v1509_v33, %v2052_v55 }
 0x1fe   : > { %v1511_v37 = vpop.f32.mrf.mxu1 }
 0x1ff   : > { %1271 = vst.msk [vmem:[%s2059_s7 + $0x18] sm:$0xf] %vm1264_vm0, %v1464_v35  ;;  %v1211_v38 = vmax.f32 %v1185_v36, 0.0  ;;  %v1512_v39 = vadd.f32 %v1511_v37, %v1510_v34 }
 0x200   : > { %v1513_v40 = vpop.f32.mrf.mxu1 }
 0x201   : > { %v1465_v41 = vpack.c.bf16 %v1211_v38, %v1211_v38  ;;  %v1190_v42 = vadd.f32 %v1512_v39, %v2052_v55 }
 0x202   : > { %v1514_v43 = vpop.f32.mrf.mxu1 }
 0x203   : > { %1272 = vst.msk [vmem:[%s2059_s7 + $0x1c] sm:$0xf] %vm1264_vm0, %v1465_v41  ;;  %v1212_v44 = vmax.f32 %v1190_v42, 0.0  ;;  %v1515_v47 = vadd.f32 %v1514_v43, %v1513_v40 }
 0x204   : > { %v1516_v48 = vpop.f32.mrf.mxu1 }
 0x205   : > { %v1466_v49 = vpack.c.bf16 %v1212_v44, %v1212_v44  ;;  %v1193_v50 = vadd.f32 %v1515_v47, %v2052_v55 }
 0x206   : > { %v1517_v51 = vpop.f32.mrf.mxu1 }
 0x207   : > { %1273 = vst.msk [vmem:[%s2059_s7 + $0x20] sm:$0xf] %vm1264_vm0, %v1466_v49  ;;  %v1213_v52 = vmax.f32 %v1193_v50, 0.0  ;;  %v1518_v53 = vadd.f32 %v1517_v51, %v1516_v48 }
 0x208   : > { %v1519_v54 = vpop.f32.mrf.mxu1 }
 0x209   : > { %v1467_v46 = vpack.c.bf16 %v1213_v52, %v1213_v52  ;;  %v1198_v45 = vadd.f32 %v1518_v53, %v2052_v55 }
 0x20a   : > { %v1520_v56 = vpop.f32.mrf.mxu1 }
 0x20b   : > { %1274 = vst.msk [vmem:[%s2059_s7 + $0x24] sm:$0xf] %vm1264_vm0, %v1467_v46  ;;  %v1214_v57 = vmax.f32 %v1198_v45, 0.0  ;;  %v1521_v58 = vadd.f32 %v1520_v56, %v1519_v54 }
 0x20d   : > { %v1468_v59 = vpack.c.bf16 %v1214_v57, %v1214_v57  ;;  %v1201_v60 = vadd.f32 %v1521_v58, %v2052_v55 }
 0x20f   : > { %1275 = vst.msk [vmem:[%s2059_s7 + $0x28] sm:$0xf] %vm1264_vm0, %v1468_v59  ;;  %v1215_v61 = vmax.f32 %v1201_v60, 0.0 }
 0x211   : > { %v1469_v62 = vpack.c.bf16 %v1215_v61, %v1215_v61 }
 0x213   : > { %1276 = vst.msk [vmem:[%s2059_s7 + $0x2c] sm:$0xf] %vm1264_vm0, %v1469_v62 }
 0x214 PF: > { %s15_s18 = sadd.s32 1, %s1702_s18  }
 0x215   : > { %p12_p4 = scmp.ge.s32.totalorder %s15_s18, 4  }
 0x217   :  { %14 = sbr.rel (!%p12_p4) target bundleno = 1 (0x1), region = 70 }

// kernel: policy_forward.3
= control target key start
LH: loop header
LB: loop body
LE: loop exit
PB: predicated region body
PF: predicated region fallthrough
CT: control target
= control target key end

     0   :  { %s5519_s1 = inlined_call_operand.vmem [shape: bf16[3072,256], index: 1, kind: input, shape index: {}]   ;;  %s5520_s0 = inlined_call_operand.vmem [shape: bf16[8,3072], index: 0, kind: input, shape index: {}]   ;;  %s5521_s2 = inlined_call_operand.vmem [shape: f32[1,256], index: 2, kind: input, shape index: {}]   ;;  %s5522_s3 = inlined_call_operand.vmem [shape: bf16[256,128], index: 3, kind: input, shape index: {}]   ;;  %s5523_s4 = inlined_call_operand.vmem [shape: f32[1,128], index: 4, kind: input, shape index: {}]   ;;  %s5524_s5 = inlined_call_operand.vmem [shape: f32[8,128], index: 5, kind: output, shape index: {}]  }
   0x1   :  { %v3556_v0 = vld [vmem:[%s5519_s1 + $0x74] ss:$8 sps:$4 sm:$0xff]   ;;  %v3560_v2 = vld [vmem:[%s5519_s1 + $0x70] ss:$8 sps:$4 sm:$0xff]   ;;  %v3562_v4 = vld [vmem:[%s5519_s1 + $0x64] ss:$8 sps:$4 sm:$0xff]  }
   0x2   :  { %v3558_v1 = vld [vmem:[%s5519_s1 + $0x174] ss:$8 sps:$4 sm:$0xff]   ;;  %2433 = vmatprep.subr.bf16.mxu0 %v3556_v0  ;;  %v3561_v3 = vld [vmem:[%s5519_s1 + $0x170] ss:$8 sps:$4 sm:$0xff]   ;;  %v3564_v5 = vld [vmem:[%s5519_s1 + $0x164] ss:$8 sps:$4 sm:$0xff]  }
   0x3   :  { %2474 = vmatprep.subr.bf16.mxu1 %v3558_v1  ;;  %2434 = vmatpush1.bf16.msra.mxu0 %v3560_v2  ;;  %v3566_v6 = vld [vmem:[%s5519_s1 + $0x60] ss:$8 sps:$4 sm:$0xff]   ;;  %v3568_v8 = vld [vmem:[%s5519_s1 + $0x54] ss:$8 sps:$4 sm:$0xff]   ;;  %v3572_v10 = vld [vmem:[%s5519_s1 + $0x50] ss:$8 sps:$4 sm:$0xff]  }
   0x4   :  { %2475 = vmatpush1.bf16.msra.mxu1 %v3561_v3  ;;  %2435 = vmatprep.subr.bf16.mxu0 %v3562_v4  ;;  %v3567_v7 = vld [vmem:[%s5519_s1 + $0x160] ss:$8 sps:$4 sm:$0xff]   ;;  %v3570_v9 = vld [vmem:[%s5519_s1 + $0x154] ss:$8 sps:$4 sm:$0xff]   ;;  %v3573_v11 = vld [vmem:[%s5519_s1 + $0x150] ss:$8 sps:$4 sm:$0xff]  }
   0x5   :  { %2476 = vmatprep.subr.bf16.mxu1 %v3564_v5  ;;  %v3574_v12 = vld [vmem:[%s5519_s1 + $0x44] ss:$8 sps:$4 sm:$0xff]   ;;  %v3578_v14 = vld [vmem:[%s5519_s1 + $0x40] ss:$8 sps:$4 sm:$0xff]   ;;  %v3580_v16 = vld [vmem:[%s5519_s1 + $0x34] ss:$8 sps:$4 sm:$0xff]  }
   0x6   :  { %v3576_v13 = vld [vmem:[%s5519_s1 + $0x144] ss:$8 sps:$4 sm:$0xff]   ;;  %v3579_v15 = vld [vmem:[%s5519_s1 + $0x140] ss:$8 sps:$4 sm:$0xff]   ;;  %v3582_v17 = vld [vmem:[%s5519_s1 + $0x134] ss:$8 sps:$4 sm:$0xff]  }
   0x7   :  { %2436 = vmatpush1.bf16.msra.mxu0 %v3566_v6  ;;  %v3584_v18 = vld [vmem:[%s5519_s1 + $0x30] ss:$8 sps:$4 sm:$0xff]   ;;  %v3586_v20 = vld [vmem:[%s5519_s1 + $0x24] ss:$8 sps:$4 sm:$0xff]   ;;  %v3590_v22 = vld [vmem:[%s5519_s1 + $0x20] ss:$8 sps:$4 sm:$0xff]  }
   0x8   :  { %2477 = vmatpush1.bf16.msra.mxu1 %v3567_v7  ;;  %2437 = vmatprep.subr.bf16.mxu0 %v3568_v8  ;;  %v3585_v19 = vld [vmem:[%s5519_s1 + $0x130] ss:$8 sps:$4 sm:$0xff]   ;;  %v3588_v21 = vld [vmem:[%s5519_s1 + $0x124] ss:$8 sps:$4 sm:$0xff]   ;;  %v3591_v23 = vld [vmem:[%s5519_s1 + $0x120] ss:$8 sps:$4 sm:$0xff]  }
   0x9   :  { %2478 = vmatprep.subr.bf16.mxu1 %v3570_v9  ;;  %v3592_v24 = vld [vmem:[%s5519_s1 + $0x14] ss:$8 sps:$4 sm:$0xff]   ;;  %v3596_v26 = vld [vmem:[%s5519_s1 + $0x10] ss:$8 sps:$4 sm:$0xff]   ;;  %v3598_v28 = vld [vmem:[%s5519_s1 + $0x4] ss:$8 sps:$4 sm:$0xff]  }
   0xa   :  { %v3594_v25 = vld [vmem:[%s5519_s1 + $0x114] ss:$8 sps:$4 sm:$0xff]   ;;  %v3597_v27 = vld [vmem:[%s5519_s1 + $0x110] ss:$8 sps:$4 sm:$0xff]   ;;  %v3600_v29 = vld [vmem:[%s5519_s1 + $0x104] ss:$8 sps:$4 sm:$0xff]  }
   0xb   :  { %2438 = vmatpush1.bf16.msra.mxu0 %v3572_v10  ;;  %v3602_v30 = vld [vmem:[%s5519_s1] ss:$8 sps:$4 sm:$0xff]   ;;  %v3604_v32 = vld [vmem:[%s5519_s1 + $0xf4] ss:$8 sps:$4 sm:$0xff]   ;;  %v3608_v34 = vld [vmem:[%s5519_s1 + $0xf0] ss:$8 sps:$4 sm:$0xff]  }
   0xc   :  { %2479 = vmatpush1.bf16.msra.mxu1 %v3573_v11  ;;  %2439 = vmatprep.subr.bf16.mxu0 %v3574_v12  ;;  %v3603_v31 = vld [vmem:[%s5519_s1 + $0x100] ss:$8 sps:$4 sm:$0xff]   ;;  %v3606_v33 = vld [vmem:[%s5519_s1 + $0x1f4] ss:$8 sps:$4 sm:$0xff]   ;;  %v3609_v35 = vld [vmem:[%s5519_s1 + $0x1f0] ss:$8 sps:$4 sm:$0xff]  }
   0xd   :  { %2480 = vmatprep.subr.bf16.mxu1 %v3576_v13  ;;  %v3610_v36 = vld [vmem:[%s5519_s1 + $0xe4] ss:$8 sps:$4 sm:$0xff]   ;;  %v3614_v38 = vld [vmem:[%s5519_s1 + $0xe0] ss:$8 sps:$4 sm:$0xff]   ;;  %v3616_v40 = vld [vmem:[%s5519_s1 + $0xd4] ss:$8 sps:$4 sm:$0xff]  }
   0xe   :  { %v3612_v37 = vld [vmem:[%s5519_s1 + $0x1e4] ss:$8 sps:$4 sm:$0xff]   ;;  %v3615_v39 = vld [vmem:[%s5519_s1 + $0x1e0] ss:$8 sps:$4 sm:$0xff]   ;;  %v3618_v41 = vld [vmem:[%s5519_s1 + $0x1d4] ss:$8 sps:$4 sm:$0xff]  }
   0xf   :  { %2440 = vmatpush1.bf16.msra.mxu0 %v3578_v14  ;;  %v3620_v42 = vld [vmem:[%s5519_s1 + $0xd0] ss:$8 sps:$4 sm:$0xff]   ;;  %v3622_v44 = vld [vmem:[%s5519_s1 + $0xc4] ss:$8 sps:$4 sm:$0xff]   ;;  %v3626_v49 = vld [vmem:[%s5519_s1 + $0xc0] ss:$8 sps:$4 sm:$0xff]  }
  0x10   :  { %2481 = vmatpush1.bf16.msra.mxu1 %v3579_v15  ;;  %2441 = vmatprep.subr.bf16.mxu0 %v3580_v16  ;;  %v3621_v43 = vld [vmem:[%s5519_s1 + $0x1d0] ss:$8 sps:$4 sm:$0xff]   ;;  %v3624_v45 = vld [vmem:[%s5519_s1 + $0x1c4] ss:$8 sps:$4 sm:$0xff]   ;;  %v3627_v50 = vld [vmem:[%s5519_s1 + $0x1c0] ss:$8 sps:$4 sm:$0xff]  }
  0x11   :  { %2482 = vmatprep.subr.bf16.mxu1 %v3582_v17  ;;  %v21_v46 = vld [vmem:[%s5520_s0] sm:$0xff]  ;;  %v22_v48 = vld [vmem:[%s5520_s0 + $0x8] sm:$0xff]  ;;  %v3628_v52 = vld [vmem:[%s5519_s1 + $0xb4] ss:$8 sps:$4 sm:$0xff]  }
  0x12   :  { %v3110_v47 = vcombine.high %v21_v46, %v21_v46  ;;  %v3112_v51 = vcombine.high %v22_v48, %v22_v48  ;;  %v3630_v53 = vld [vmem:[%s5519_s1 + $0x1b4] ss:$8 sps:$4 sm:$0xff]   ;;  %v3632_v54 = vld [vmem:[%s5519_s1 + $0xb0] ss:$8 sps:$4 sm:$0xff]   ;;  %v3634_v56 = vld [vmem:[%s5519_s1 + $0xa4] ss:$8 sps:$4 sm:$0xff]   ;;  %v3109_v6 = vcombine.low %v21_v46, %v21_v46  ;;  %v3111_v7 = vcombine.low %v22_v48, %v22_v48 }
  0x13   :  { %2442 = vmatpush1.bf16.msra.mxu0 %v3584_v18  ;;  %v3633_v55 = vld [vmem:[%s5519_s1 + $0x1b0] ss:$8 sps:$4 sm:$0xff]   ;;  %v3636_v57 = vld [vmem:[%s5519_s1 + $0x1a4] ss:$8 sps:$4 sm:$0xff]   ;;  %v3638_v58 = vld [vmem:[%s5519_s1 + $0xa0] ss:$8 sps:$4 sm:$0xff]  }
  0x14   :  { %2483 = vmatpush1.bf16.msra.mxu1 %v3585_v19  ;;  %2443 = vmatprep.subr.bf16.mxu0 %v3586_v20  ;;  %v3639_v59 = vld [vmem:[%s5519_s1 + $0x1a0] ss:$8 sps:$4 sm:$0xff]   ;;  %v3640_v60 = vld [vmem:[%s5519_s1 + $0x94] ss:$8 sps:$4 sm:$0xff]   ;;  %v3644_v62 = vld [vmem:[%s5519_s1 + $0x90] ss:$8 sps:$4 sm:$0xff]  }
  0x15   :  { %2484 = vmatprep.subr.bf16.mxu1 %v3588_v21  ;;  %2465 = vmatprep.mubr.bf16.mxu0 %v3110_v47  ;;  %v3642_v61 = vld [vmem:[%s5519_s1 + $0x194] ss:$8 sps:$4 sm:$0xff]   ;;  %v3645_v63 = vld [vmem:[%s5519_s1 + $0x190] ss:$8 sps:$4 sm:$0xff]   ;;  %v3646_v0 = vld [vmem:[%s5519_s1 + $0x84] ss:$8 sps:$4 sm:$0xff]  }
  0x16   :  { %2506 = vmatprep.mubr.bf16.mxu1 %v3112_v51  ;;  %v3648_v1 = vld [vmem:[%s5519_s1 + $0x184] ss:$8 sps:$4 sm:$0xff]   ;;  %v3650_v2 = vld [vmem:[%s5519_s1 + $0x80] ss:$8 sps:$4 sm:$0xff]   ;;  %v3658_v4 = vld [vmem:[%s5519_s1 + $0x274] ss:$8 sps:$4 sm:$0xff]  }
  0x17   :  { %2444 = vmatpush1.bf16.msra.mxu0 %v3590_v22  ;;  %v3651_v3 = vld [vmem:[%s5519_s1 + $0x180] ss:$8 sps:$4 sm:$0xff]   ;;  %v3661_v5 = vld [vmem:[%s5519_s1 + $0x374] ss:$8 sps:$4 sm:$0xff]   ;;  %v3656_v8 = vld [vmem:[%s5519_s1 + $0x270] ss:$8 sps:$4 sm:$0xff]  }
  0x18   :  { %2485 = vmatpush1.bf16.msra.mxu1 %v3591_v23  ;;  %2445 = vmatprep.subr.bf16.mxu0 %v3592_v24  ;;  %v3659_v9 = vld [vmem:[%s5519_s1 + $0x370] ss:$8 sps:$4 sm:$0xff]   ;;  %v3664_v10 = vld [vmem:[%s5519_s1 + $0x264] ss:$8 sps:$4 sm:$0xff]   ;;  %v3662_v12 = vld [vmem:[%s5519_s1 + $0x260] ss:$8 sps:$4 sm:$0xff]  }
  0x19   :  { %2486 = vmatprep.subr.bf16.mxu1 %v3594_v25  ;;  %v3667_v11 = vld [vmem:[%s5519_s1 + $0x364] ss:$8 sps:$4 sm:$0xff]   ;;  %v3665_v13 = vld [vmem:[%s5519_s1 + $0x360] ss:$8 sps:$4 sm:$0xff]   ;;  %v3670_v14 = vld [vmem:[%s5519_s1 + $0x254] ss:$8 sps:$4 sm:$0xff]  }
  0x1a   :  { %v3673_v15 = vld [vmem:[%s5519_s1 + $0x354] ss:$8 sps:$4 sm:$0xff]   ;;  %v3668_v16 = vld [vmem:[%s5519_s1 + $0x250] ss:$8 sps:$4 sm:$0xff]   ;;  %v3676_v18 = vld [vmem:[%s5519_s1 + $0x244] ss:$8 sps:$4 sm:$0xff]  }
  0x1b   :  { %2446 = vmatpush1.bf16.msra.mxu0 %v3596_v26  ;;  %v3671_v17 = vld [vmem:[%s5519_s1 + $0x350] ss:$8 sps:$4 sm:$0xff]   ;;  %v3679_v19 = vld [vmem:[%s5519_s1 + $0x344] ss:$8 sps:$4 sm:$0xff]   ;;  %v3674_v20 = vld [vmem:[%s5519_s1 + $0x240] ss:$8 sps:$4 sm:$0xff]  }
  0x1c   :  { %2487 = vmatpush1.bf16.msra.mxu1 %v3597_v27  ;;  %2447 = vmatprep.subr.bf16.mxu0 %v3598_v28  ;;  %v3677_v21 = vld [vmem:[%s5519_s1 + $0x340] ss:$8 sps:$4 sm:$0xff]   ;;  %v3682_v22 = vld [vmem:[%s5519_s1 + $0x234] ss:$8 sps:$4 sm:$0xff]   ;;  %v3680_v24 = vld [vmem:[%s5519_s1 + $0x230] ss:$8 sps:$4 sm:$0xff]  }
  0x1d   :  { %2488 = vmatprep.subr.bf16.mxu1 %v3600_v29  ;;  %v3685_v23 = vld [vmem:[%s5519_s1 + $0x334] ss:$8 sps:$4 sm:$0xff]   ;;  %v3683_v25 = vld [vmem:[%s5519_s1 + $0x330] ss:$8 sps:$4 sm:$0xff]   ;;  %v3688_v26 = vld [vmem:[%s5519_s1 + $0x224] ss:$8 sps:$4 sm:$0xff]  }
  0x1e   :  { %v3691_v27 = vld [vmem:[%s5519_s1 + $0x324] ss:$8 sps:$4 sm:$0xff]   ;;  %v3686_v28 = vld [vmem:[%s5519_s1 + $0x220] ss:$8 sps:$4 sm:$0xff]   ;;  %v3721_v51 = vld [vmem:[%s5519_s1 + $0x3d4] ss:$8 sps:$4 sm:$0xff]  }
  0x1f   :  { %2448 = vmatpush1.bf16.msra.mxu0 %v3602_v30  ;;  %v3689_v29 = vld [vmem:[%s5519_s1 + $0x320] ss:$8 sps:$4 sm:$0xff]   ;;  %v3694_v30 = vld [vmem:[%s5519_s1 + $0x214] ss:$8 sps:$4 sm:$0xff]   ;;  %v3712_v46 = vld [vmem:[%s5519_s1 + $0x2e4] ss:$8 sps:$4 sm:$0xff]  }
  0x20   :  { %2489 = vmatpush1.bf16.msra.mxu1 %v3603_v31  ;;  %2449 = vmatprep.subr.bf16.mxu0 %v3604_v32  ;;  %v3697_v31 = vld [vmem:[%s5519_s1 + $0x314] ss:$8 sps:$4 sm:$0xff]   ;;  %v3715_v47 = vld [vmem:[%s5519_s1 + $0x3e4] ss:$8 sps:$4 sm:$0xff]   ;;  %v3710_v48 = vld [vmem:[%s5519_s1 + $0x2e0] ss:$8 sps:$4 sm:$0xff]  }
  0x21   :  { %2490 = vmatprep.subr.bf16.mxu1 %v3606_v33  ;;  %v4481_v32 = vld [vmem:[%s5520_s0 + $0x10] sm:$0xff]  ;;  %v4486_v33 = vld [vmem:[%s5520_s0 + $0x18] sm:$0xff] }
  0x23   :  { %2450 = vmatpush2.bf16.msra.mxu0 %v3608_v34  ;;  %v3692_v34 = vld [vmem:[%s5519_s1 + $0x210] ss:$8 sps:$4 sm:$0xff]  }
  0x24   :  { %2491 = vmatpush2.bf16.msra.mxu1 %v3609_v35  ;;  %2451 = vmatprep.subr.bf16.mxu0 %v3610_v36  ;;  %v3695_v35 = vld [vmem:[%s5519_s1 + $0x310] ss:$8 sps:$4 sm:$0xff]   ;;  %v3114_v36 = vcombine.high %v4481_v32, %v4481_v32 }
  0x25   :  { %2492 = vmatprep.subr.bf16.mxu1 %v3612_v37  ;;  %v3116_v37 = vcombine.high %v4486_v33, %v4486_v33 }
  0x27   :  { %2452 = vmatpush2.bf16.msra.mxu0 %v3614_v38  ;;  %v3700_v38 = vld [vmem:[%s5519_s1 + $0x204] ss:$8 sps:$4 sm:$0xff]  }
  0x28   :  { %2493 = vmatpush2.bf16.msra.mxu1 %v3615_v39  ;;  %2453 = vmatprep.subr.bf16.mxu0 %v3616_v40  ;;  %v3703_v39 = vld [vmem:[%s5519_s1 + $0x304] ss:$8 sps:$4 sm:$0xff]   ;;  %v3698_v40 = vld [vmem:[%s5519_s1 + $0x200] ss:$8 sps:$4 sm:$0xff]  }
  0x29   :  { %2494 = vmatprep.subr.bf16.mxu1 %v3618_v41  ;;  %v3701_v41 = vld [vmem:[%s5519_s1 + $0x300] ss:$8 sps:$4 sm:$0xff]  }
  0x2b   :  { %2454 = vmatpush2.bf16.msra.mxu0 %v3620_v42  ;;  %v3706_v42 = vld [vmem:[%s5519_s1 + $0x2f4] ss:$8 sps:$4 sm:$0xff]  }
  0x2c   :  { %2495 = vmatpush2.bf16.msra.mxu1 %v3621_v43  ;;  %2455 = vmatprep.subr.bf16.mxu0 %v3622_v44  ;;  %v3709_v43 = vld [vmem:[%s5519_s1 + $0x3f4] ss:$8 sps:$4 sm:$0xff]   ;;  %v3704_v44 = vld [vmem:[%s5519_s1 + $0x2f0] ss:$8 sps:$4 sm:$0xff]  }
  0x2d   :  { %2496 = vmatprep.subr.bf16.mxu1 %v3624_v45  ;;  %v3707_v45 = vld [vmem:[%s5519_s1 + $0x3f0] ss:$8 sps:$4 sm:$0xff]  }
  0x2f   :  { %2456 = vmatpush2.bf16.msra.mxu0 %v3626_v49  ;;  %v3713_v49 = vld [vmem:[%s5519_s1 + $0x3e0] ss:$8 sps:$4 sm:$0xff]  }
  0x30   :  { %2497 = vmatpush2.bf16.msra.mxu1 %v3627_v50  ;;  %2457 = vmatprep.subr.bf16.mxu0 %v3628_v52  ;;  %v3718_v50 = vld [vmem:[%s5519_s1 + $0x2d4] ss:$8 sps:$4 sm:$0xff]   ;;  %v3716_v52 = vld [vmem:[%s5519_s1 + $0x2d0] ss:$8 sps:$4 sm:$0xff]  }
  0x31   :  { %2498 = vmatprep.subr.bf16.mxu1 %v3630_v53  ;;  %v3719_v53 = vld [vmem:[%s5519_s1 + $0x3d0] ss:$8 sps:$4 sm:$0xff]  }
  0x33   :  { %2458 = vmatpush2.bf16.msra.mxu0 %v3632_v54  ;;  %v3724_v54 = vld [vmem:[%s5519_s1 + $0x2c4] ss:$8 sps:$4 sm:$0xff]  }
  0x34   :  { %2499 = vmatpush2.bf16.msra.mxu1 %v3633_v55  ;;  %2459 = vmatprep.subr.bf16.mxu0 %v3634_v56  ;;  %v3727_v55 = vld [vmem:[%s5519_s1 + $0x3c4] ss:$8 sps:$4 sm:$0xff]   ;;  %v3722_v56 = vld [vmem:[%s5519_s1 + $0x2c0] ss:$8 sps:$4 sm:$0xff]  }
  0x35   :  { %2500 = vmatprep.subr.bf16.mxu1 %v3636_v57  ;;  %v3725_v57 = vld [vmem:[%s5519_s1 + $0x3c0] ss:$8 sps:$4 sm:$0xff]  }
  0x37   :  { %2460 = vmatpush2.bf16.msra.mxu0 %v3638_v58  ;;  %v3730_v58 = vld [vmem:[%s5519_s1 + $0x2b4] ss:$8 sps:$4 sm:$0xff]  }
  0x38   :  { %2501 = vmatpush2.bf16.msra.mxu1 %v3639_v59  ;;  %2461 = vmatprep.subr.bf16.mxu0 %v3640_v60  ;;  %v3733_v59 = vld [vmem:[%s5519_s1 + $0x3b4] ss:$8 sps:$4 sm:$0xff]   ;;  %v3728_v60 = vld [vmem:[%s5519_s1 + $0x2b0] ss:$8 sps:$4 sm:$0xff]  }
  0x39   :  { %2502 = vmatprep.subr.bf16.mxu1 %v3642_v61  ;;  %v3731_v61 = vld [vmem:[%s5519_s1 + $0x3b0] ss:$8 sps:$4 sm:$0xff]  }
  0x3b   :  { %2462 = vmatpush2.bf16.msra.mxu0 %v3644_v62  ;;  %v3736_v62 = vld [vmem:[%s5519_s1 + $0x2a4] ss:$8 sps:$4 sm:$0xff]  }
  0x3c   :  { %2503 = vmatpush2.bf16.msra.mxu1 %v3645_v63  ;;  %2463 = vmatprep.subr.bf16.mxu0 %v3646_v0  ;;  %v3739_v63 = vld [vmem:[%s5519_s1 + $0x3a4] ss:$8 sps:$4 sm:$0xff]   ;;  %v3734_v0 = vld [vmem:[%s5519_s1 + $0x2a0] ss:$8 sps:$4 sm:$0xff]  }
  0x3d   :  { %2504 = vmatprep.subr.bf16.mxu1 %v3648_v1  ;;  %v3737_v1 = vld [vmem:[%s5519_s1 + $0x3a0] ss:$8 sps:$4 sm:$0xff]  }
  0x3f   :  { %2464 = vmatpush2.bf16.msra.mxu0 %v3650_v2  ;;  %v3742_v2 = vld [vmem:[%s5519_s1 + $0x294] ss:$8 sps:$4 sm:$0xff]  }
  0x40   :  { %2505 = vmatpush2.bf16.msra.mxu1 %v3651_v3  ;;  %2515 = vmatprep.subr.bf16.mxu0 %v3658_v4  ;;  %v3745_v3 = vld [vmem:[%s5519_s1 + $0x394] ss:$8 sps:$4 sm:$0xff]   ;;  %v3740_v4 = vld [vmem:[%s5519_s1 + $0x290] ss:$8 sps:$4 sm:$0xff]  }
  0x41   :  { %2556 = vmatprep.subr.bf16.mxu1 %v3661_v5  ;;  %v3743_v5 = vld [vmem:[%s5519_s1 + $0x390] ss:$8 sps:$4 sm:$0xff]  }
  0x42   :  { %2466 = vmatmul.mubr.bf16.vlgmr.msra.gmra.mxu0 %v3109_v6  ;;  %v3748_v6 = vld [vmem:[%s5519_s1 + $0x284] ss:$8 sps:$4 sm:$0xff]  }
  0x43   :  { %2507 = vmatmul.mubr.bf16.vlgmr.msra.gmra.mxu1 %v3111_v7  ;;  %2516 = vmatpush1.bf16.msra.mxu0 %v3656_v8  ;;  %v3751_v7 = vld [vmem:[%s5519_s1 + $0x384] ss:$8 sps:$4 sm:$0xff]   ;;  %v3746_v8 = vld [vmem:[%s5519_s1 + $0x280] ss:$8 sps:$4 sm:$0xff]  }
  0x44   :  { %2557 = vmatpush1.bf16.msra.mxu1 %v3659_v9  ;;  %2517 = vmatprep.subr.bf16.mxu0 %v3664_v10  ;;  %v3749_v9 = vld [vmem:[%s5519_s1 + $0x380] ss:$8 sps:$4 sm:$0xff]   ;;  %v3758_v10 = vld [vmem:[%s5519_s1 + $0x474] ss:$8 sps:$4 sm:$0xff]  }
  0x45   :  { %2558 = vmatprep.subr.bf16.mxu1 %v3667_v11  ;;  %2547 = vmatprep.mubr.bf16.mxu0 %v3114_v36  ;;  %v3761_v11 = vld [vmem:[%s5519_s1 + $0x574] ss:$8 sps:$4 sm:$0xff]   ;;  %v3788_v36 = vld [vmem:[%s5519_s1 + $0x424] ss:$8 sps:$4 sm:$0xff]  }
  0x46   :  { %2588 = vmatprep.mubr.bf16.mxu1 %v3116_v37  ;;  %v3791_v37 = vld [vmem:[%s5519_s1 + $0x524] ss:$8 sps:$4 sm:$0xff]  }
  0x47   :  { %2518 = vmatpush1.bf16.msra.mxu0 %v3662_v12  ;;  %v3113_v12 = vcombine.low %v4481_v32, %v4481_v32  ;;  %v3782_v32 = vld [vmem:[%s5519_s1 + $0x434] ss:$8 sps:$4 sm:$0xff]  }
  0x48   :  { %2559 = vmatpush1.bf16.msra.mxu1 %v3665_v13  ;;  %2519 = vmatprep.subr.bf16.mxu0 %v3670_v14  ;;  %v3115_v13 = vcombine.low %v4486_v33, %v4486_v33  ;;  %v3756_v14 = vld [vmem:[%s5519_s1 + $0x470] ss:$8 sps:$4 sm:$0xff]   ;;  %v3785_v33 = vld [vmem:[%s5519_s1 + $0x534] ss:$8 sps:$4 sm:$0xff]  }
  0x49   :  { %2560 = vmatprep.subr.bf16.mxu1 %v3673_v15  ;;  %v3759_v15 = vld [vmem:[%s5519_s1 + $0x570] ss:$8 sps:$4 sm:$0xff]  }
  0x4b   :  { %2520 = vmatpush1.bf16.msra.mxu0 %v3668_v16  ;;  %v3764_v16 = vld [vmem:[%s5519_s1 + $0x464] ss:$8 sps:$4 sm:$0xff]  }
  0x4c   :  { %2561 = vmatpush1.bf16.msra.mxu1 %v3671_v17  ;;  %2521 = vmatprep.subr.bf16.mxu0 %v3676_v18  ;;  %v3767_v17 = vld [vmem:[%s5519_s1 + $0x564] ss:$8 sps:$4 sm:$0xff]  }
  0x4d   :  { %2562 = vmatprep.subr.bf16.mxu1 %v3679_v19  ;;  %v4631_v18 = vld [vmem:[%s5520_s0 + $0x20] sm:$0xff]  ;;  %v4636_v19 = vld [vmem:[%s5520_s0 + $0x28] sm:$0xff] }
  0x4f   :  { %2522 = vmatpush1.bf16.msra.mxu0 %v3674_v20  ;;  %v3118_v20 = vcombine.high %v4631_v18, %v4631_v18 }
  0x50   :  { %2563 = vmatpush1.bf16.msra.mxu1 %v3677_v21  ;;  %2523 = vmatprep.subr.bf16.mxu0 %v3682_v22  ;;  %v3120_v21 = vcombine.high %v4636_v19, %v4636_v19  ;;  %v3762_v22 = vld [vmem:[%s5519_s1 + $0x460] ss:$8 sps:$4 sm:$0xff]  }
  0x51   :  { %2564 = vmatprep.subr.bf16.mxu1 %v3685_v23  ;;  %v3765_v23 = vld [vmem:[%s5519_s1 + $0x560] ss:$8 sps:$4 sm:$0xff]  }
  0x53   :  { %2524 = vmatpush1.bf16.msra.mxu0 %v3680_v24  ;;  %v3770_v24 = vld [vmem:[%s5519_s1 + $0x454] ss:$8 sps:$4 sm:$0xff]  }
  0x54   :  { %2565 = vmatpush1.bf16.msra.mxu1 %v3683_v25  ;;  %2525 = vmatprep.subr.bf16.mxu0 %v3688_v26  ;;  %v3773_v25 = vld [vmem:[%s5519_s1 + $0x554] ss:$8 sps:$4 sm:$0xff]   ;;  %v3768_v26 = vld [vmem:[%s5519_s1 + $0x450] ss:$8 sps:$4 sm:$0xff]  }
  0x55   :  { %2566 = vmatprep.subr.bf16.mxu1 %v3691_v27  ;;  %v3771_v27 = vld [vmem:[%s5519_s1 + $0x550] ss:$8 sps:$4 sm:$0xff]  }
  0x57   :  { %2526 = vmatpush1.bf16.msra.mxu0 %v3686_v28  ;;  %v3776_v28 = vld [vmem:[%s5519_s1 + $0x444] ss:$8 sps:$4 sm:$0xff]  }
  0x58   :  { %2567 = vmatpush1.bf16.msra.mxu1 %v3689_v29  ;;  %2527 = vmatprep.subr.bf16.mxu0 %v3694_v30  ;;  %v3779_v29 = vld [vmem:[%s5519_s1 + $0x544] ss:$8 sps:$4 sm:$0xff]   ;;  %v3774_v30 = vld [vmem:[%s5519_s1 + $0x440] ss:$8 sps:$4 sm:$0xff]  }
  0x59   :  { %2568 = vmatprep.subr.bf16.mxu1 %v3697_v31  ;;  %v3777_v31 = vld [vmem:[%s5519_s1 + $0x540] ss:$8 sps:$4 sm:$0xff]  }
  0x5b   :  { %2528 = vmatpush1.bf16.msra.mxu0 %v3692_v34  ;;  %v3780_v34 = vld [vmem:[%s5519_s1 + $0x430] ss:$8 sps:$4 sm:$0xff]  }
  0x5c   :  { %2569 = vmatpush1.bf16.msra.mxu1 %v3695_v35  ;;  %2529 = vmatprep.subr.bf16.mxu0 %v3700_v38  ;;  %v3783_v35 = vld [vmem:[%s5519_s1 + $0x530] ss:$8 sps:$4 sm:$0xff]   ;;  %v3786_v38 = vld [vmem:[%s5519_s1 + $0x420] ss:$8 sps:$4 sm:$0xff]  }
  0x5d   :  { %2570 = vmatprep.subr.bf16.mxu1 %v3703_v39  ;;  %v3789_v39 = vld [vmem:[%s5519_s1 + $0x520] ss:$8 sps:$4 sm:$0xff]  }
  0x5f   :  { %2530 = vmatpush1.bf16.msra.mxu0 %v3698_v40  ;;  %v3794_v40 = vld [vmem:[%s5519_s1 + $0x414] ss:$8 sps:$4 sm:$0xff]  }
  0x60   :  { %2571 = vmatpush1.bf16.msra.mxu1 %v3701_v41  ;;  %2531 = vmatprep.subr.bf16.mxu0 %v3706_v42  ;;  %v3797_v41 = vld [vmem:[%s5519_s1 + $0x514] ss:$8 sps:$4 sm:$0xff]   ;;  %v3792_v42 = vld [vmem:[%s5519_s1 + $0x410] ss:$8 sps:$4 sm:$0xff]  }
  0x61   :  { %2572 = vmatprep.subr.bf16.mxu1 %v3709_v43  ;;  %v3795_v43 = vld [vmem:[%s5519_s1 + $0x510] ss:$8 sps:$4 sm:$0xff]  }
  0x63   :  { %2532 = vmatpush2.bf16.msra.mxu0 %v3704_v44  ;;  %v3800_v44 = vld [vmem:[%s5519_s1 + $0x404] ss:$8 sps:$4 sm:$0xff]  }
  0x64   :  { %2573 = vmatpush2.bf16.msra.mxu1 %v3707_v45  ;;  %2533 = vmatprep.subr.bf16.mxu0 %v3712_v46  ;;  %v3803_v45 = vld [vmem:[%s5519_s1 + $0x504] ss:$8 sps:$4 sm:$0xff]   ;;  %v3798_v46 = vld [vmem:[%s5519_s1 + $0x400] ss:$8 sps:$4 sm:$0xff]  }
  0x65   :  { %2574 = vmatprep.subr.bf16.mxu1 %v3715_v47  ;;  %v3801_v47 = vld [vmem:[%s5519_s1 + $0x500] ss:$8 sps:$4 sm:$0xff]  }
  0x67   :  { %2534 = vmatpush2.bf16.msra.mxu0 %v3710_v48  ;;  %v3806_v48 = vld [vmem:[%s5519_s1 + $0x4f4] ss:$8 sps:$4 sm:$0xff]  }
  0x68   :  { %2575 = vmatpush2.bf16.msra.mxu1 %v3713_v49  ;;  %2535 = vmatprep.subr.bf16.mxu0 %v3718_v50  ;;  %v3809_v49 = vld [vmem:[%s5519_s1 + $0x5f4] ss:$8 sps:$4 sm:$0xff]   ;;  %v3804_v50 = vld [vmem:[%s5519_s1 + $0x4f0] ss:$8 sps:$4 sm:$0xff]  }
  0x69   :  { %2576 = vmatprep.subr.bf16.mxu1 %v3721_v51  ;;  %v3807_v51 = vld [vmem:[%s5519_s1 + $0x5f0] ss:$8 sps:$4 sm:$0xff]  }
  0x6b   :  { %2536 = vmatpush2.bf16.msra.mxu0 %v3716_v52  ;;  %v3812_v52 = vld [vmem:[%s5519_s1 + $0x4e4] ss:$8 sps:$4 sm:$0xff]  }
  0x6c   :  { %2577 = vmatpush2.bf16.msra.mxu1 %v3719_v53  ;;  %2537 = vmatprep.subr.bf16.mxu0 %v3724_v54  ;;  %v3815_v53 = vld [vmem:[%s5519_s1 + $0x5e4] ss:$8 sps:$4 sm:$0xff]   ;;  %v3810_v54 = vld [vmem:[%s5519_s1 + $0x4e0] ss:$8 sps:$4 sm:$0xff]  }
  0x6d   :  { %2578 = vmatprep.subr.bf16.mxu1 %v3727_v55  ;;  %v3813_v55 = vld [vmem:[%s5519_s1 + $0x5e0] ss:$8 sps:$4 sm:$0xff]  }
  0x6f   :  { %2538 = vmatpush2.bf16.msra.mxu0 %v3722_v56  ;;  %v3818_v56 = vld [vmem:[%s5519_s1 + $0x4d4] ss:$8 sps:$4 sm:$0xff]  }
  0x70   :  { %2579 = vmatpush2.bf16.msra.mxu1 %v3725_v57  ;;  %2539 = vmatprep.subr.bf16.mxu0 %v3730_v58  ;;  %v3821_v57 = vld [vmem:[%s5519_s1 + $0x5d4] ss:$8 sps:$4 sm:$0xff]   ;;  %v3816_v58 = vld [vmem:[%s5519_s1 + $0x4d0] ss:$8 sps:$4 sm:$0xff]  }
  0x71   :  { %2580 = vmatprep.subr.bf16.mxu1 %v3733_v59  ;;  %v3819_v59 = vld [vmem:[%s5519_s1 + $0x5d0] ss:$8 sps:$4 sm:$0xff]  }
  0x73   :  { %2540 = vmatpush2.bf16.msra.mxu0 %v3728_v60  ;;  %v3824_v60 = vld [vmem:[%s5519_s1 + $0x4c4] ss:$8 sps:$4 sm:$0xff]  }
  0x74   :  { %2581 = vmatpush2.bf16.msra.mxu1 %v3731_v61  ;;  %2541 = vmatprep.subr.bf16.mxu0 %v3736_v62  ;;  %v3827_v61 = vld [vmem:[%s5519_s1 + $0x5c4] ss:$8 sps:$4 sm:$0xff]   ;;  %v3822_v62 = vld [vmem:[%s5519_s1 + $0x4c0] ss:$8 sps:$4 sm:$0xff]  }
  0x75   :  { %2582 = vmatprep.subr.bf16.mxu1 %v3739_v63  ;;  %v3825_v63 = vld [vmem:[%s5519_s1 + $0x5c0] ss:$8 sps:$4 sm:$0xff]  }
  0x77   :  { %2542 = vmatpush2.bf16.msra.mxu0 %v3734_v0  ;;  %v3830_v0 = vld [vmem:[%s5519_s1 + $0x4b4] ss:$8 sps:$4 sm:$0xff]  }
  0x78   :  { %2583 = vmatpush2.bf16.msra.mxu1 %v3737_v1  ;;  %2543 = vmatprep.subr.bf16.mxu0 %v3742_v2  ;;  %v3833_v1 = vld [vmem:[%s5519_s1 + $0x5b4] ss:$8 sps:$4 sm:$0xff]   ;;  %v3828_v2 = vld [vmem:[%s5519_s1 + $0x4b0] ss:$8 sps:$4 sm:$0xff]  }
  0x79   :  { %2584 = vmatprep.subr.bf16.mxu1 %v3745_v3  ;;  %v3831_v3 = vld [vmem:[%s5519_s1 + $0x5b0] ss:$8 sps:$4 sm:$0xff]  }
  0x7b   :  { %2544 = vmatpush2.bf16.msra.mxu0 %v3740_v4  ;;  %v3836_v4 = vld [vmem:[%s5519_s1 + $0x4a4] ss:$8 sps:$4 sm:$0xff]  }
  0x7c   :  { %2585 = vmatpush2.bf16.msra.mxu1 %v3743_v5  ;;  %2545 = vmatprep.subr.bf16.mxu0 %v3748_v6  ;;  %v3839_v5 = vld [vmem:[%s5519_s1 + $0x5a4] ss:$8 sps:$4 sm:$0xff]   ;;  %v3834_v6 = vld [vmem:[%s5519_s1 + $0x4a0] ss:$8 sps:$4 sm:$0xff]  }
  0x7d   :  { %2586 = vmatprep.subr.bf16.mxu1 %v3751_v7  ;;  %v3837_v7 = vld [vmem:[%s5519_s1 + $0x5a0] ss:$8 sps:$4 sm:$0xff]  }
  0x7f   :  { %2546 = vmatpush2.bf16.msra.mxu0 %v3746_v8  ;;  %v3842_v8 = vld [vmem:[%s5519_s1 + $0x494] ss:$8 sps:$4 sm:$0xff]  }
  0x80   :  { %2587 = vmatpush2.bf16.msra.mxu1 %v3749_v9  ;;  %2597 = vmatprep.subr.bf16.mxu0 %v3758_v10  ;;  %v3845_v9 = vld [vmem:[%s5519_s1 + $0x594] ss:$8 sps:$4 sm:$0xff]   ;;  %v3840_v10 = vld [vmem:[%s5519_s1 + $0x490] ss:$8 sps:$4 sm:$0xff]  }
  0x81   :  { %2638 = vmatprep.subr.bf16.mxu1 %v3761_v11  ;;  %v3843_v11 = vld [vmem:[%s5519_s1 + $0x590] ss:$8 sps:$4 sm:$0xff]  }
  0x82   :  { %2548 = vmatmul.mubr.bf16.vlgmr.msra.gmra.mxu0 %v3113_v12  ;;  %v3848_v12 = vld [vmem:[%s5519_s1 + $0x484] ss:$8 sps:$4 sm:$0xff]  }
  0x83   :  { %2589 = vmatmul.mubr.bf16.vlgmr.msra.gmra.mxu1 %v3115_v13  ;;  %2598 = vmatpush1.bf16.msra.mxu0 %v3756_v14  ;;  %v3851_v13 = vld [vmem:[%s5519_s1 + $0x584] ss:$8 sps:$4 sm:$0xff]   ;;  %v3846_v14 = vld [vmem:[%s5519_s1 + $0x480] ss:$8 sps:$4 sm:$0xff]  }
  0x84   :  { %2639 = vmatpush1.bf16.msra.mxu1 %v3759_v15  ;;  %2599 = vmatprep.subr.bf16.mxu0 %v3764_v16  ;;  %v3849_v15 = vld [vmem:[%s5519_s1 + $0x580] ss:$8 sps:$4 sm:$0xff]   ;;  %v3858_v16 = vld [vmem:[%s5519_s1 + $0x674] ss:$8 sps:$4 sm:$0xff]  }
  0x85   :  { %2640 = vmatprep.subr.bf16.mxu1 %v3767_v17  ;;  %2629 = vmatprep.mubr.bf16.mxu0 %v3118_v20  ;;  %v3861_v17 = vld [vmem:[%s5519_s1 + $0x774] ss:$8 sps:$4 sm:$0xff]   ;;  %v3856_v20 = vld [vmem:[%s5519_s1 + $0x670] ss:$8 sps:$4 sm:$0xff]  }
  0x86   :  { %2670 = vmatprep.mubr.bf16.mxu1 %v3120_v21  ;;  %v4828_v21 = vld [vmem:[%s5520_s0 + $0x30] sm:$0xff] }
  0x87   :  { %2600 = vmatpush1.bf16.msra.mxu0 %v3762_v22  ;;  %v3117_v22 = vcombine.low %v4631_v18, %v4631_v18  ;;  %v3864_v18 = vld [vmem:[%s5519_s1 + $0x664] ss:$8 sps:$4 sm:$0xff]  }
  0x88   :  { %2641 = vmatpush1.bf16.msra.mxu1 %v3765_v23  ;;  %2601 = vmatprep.subr.bf16.mxu0 %v3770_v24  ;;  %v3119_v23 = vcombine.low %v4636_v19, %v4636_v19  ;;  %v4837_v24 = vld [vmem:[%s5520_s0 + $0x38] sm:$0xff]  ;;  %v3867_v19 = vld [vmem:[%s5519_s1 + $0x764] ss:$8 sps:$4 sm:$0xff]  }
  0x89   :  { %2642 = vmatprep.subr.bf16.mxu1 %v3773_v25  ;;  %v3859_v25 = vld [vmem:[%s5519_s1 + $0x770] ss:$8 sps:$4 sm:$0xff]  }
  0x8b   :  { %2602 = vmatpush1.bf16.msra.mxu0 %v3768_v26  ;;  %v3122_v26 = vcombine.high %v4828_v21, %v4828_v21 }
  0x8c   :  { %2643 = vmatpush1.bf16.msra.mxu1 %v3771_v27  ;;  %2603 = vmatprep.subr.bf16.mxu0 %v3776_v28  ;;  %v3124_v27 = vcombine.high %v4837_v24, %v4837_v24  ;;  %v3862_v28 = vld [vmem:[%s5519_s1 + $0x660] ss:$8 sps:$4 sm:$0xff]  }
  0x8d   :  { %2644 = vmatprep.subr.bf16.mxu1 %v3779_v29  ;;  %v3865_v29 = vld [vmem:[%s5519_s1 + $0x760] ss:$8 sps:$4 sm:$0xff]  }
  0x8f   :  { %2604 = vmatpush1.bf16.msra.mxu0 %v3774_v30  ;;  %v3870_v30 = vld [vmem:[%s5519_s1 + $0x654] ss:$8 sps:$4 sm:$0xff]  }
  0x90   :  { %2645 = vmatpush1.bf16.msra.mxu1 %v3777_v31  ;;  %2605 = vmatprep.subr.bf16.mxu0 %v3782_v32  ;;  %v3873_v31 = vld [vmem:[%s5519_s1 + $0x754] ss:$8 sps:$4 sm:$0xff]   ;;  %v3868_v32 = vld [vmem:[%s5519_s1 + $0x650] ss:$8 sps:$4 sm:$0xff]  }
  0x91   :  { %2646 = vmatprep.subr.bf16.mxu1 %v3785_v33  ;;  %v3871_v33 = vld [vmem:[%s5519_s1 + $0x750] ss:$8 sps:$4 sm:$0xff]  }
  0x93   :  { %2606 = vmatpush1.bf16.msra.mxu0 %v3780_v34  ;;  %v3876_v34 = vld [vmem:[%s5519_s1 + $0x644] ss:$8 sps:$4 sm:$0xff]  }
  0x94   :  { %2647 = vmatpush1.bf16.msra.mxu1 %v3783_v35  ;;  %2607 = vmatprep.subr.bf16.mxu0 %v3788_v36  ;;  %v3879_v35 = vld [vmem:[%s5519_s1 + $0x744] ss:$8 sps:$4 sm:$0xff]   ;;  %v3874_v36 = vld [vmem:[%s5519_s1 + $0x640] ss:$8 sps:$4 sm:$0xff]  }
  0x95   :  { %2648 = vmatprep.subr.bf16.mxu1 %v3791_v37  ;;  %v3877_v37 = vld [vmem:[%s5519_s1 + $0x740] ss:$8 sps:$4 sm:$0xff]  }
  0x97   :  { %2608 = vmatpush1.bf16.msra.mxu0 %v3786_v38  ;;  %v3882_v38 = vld [vmem:[%s5519_s1 + $0x634] ss:$8 sps:$4 sm:$0xff]  }
  0x98   :  { %2649 = vmatpush1.bf16.msra.mxu1 %v3789_v39  ;;  %2609 = vmatprep.subr.bf16.mxu0 %v3794_v40  ;;  %v3885_v39 = vld [vmem:[%s5519_s1 + $0x734] ss:$8 sps:$4 sm:$0xff]   ;;  %v3880_v40 = vld [vmem:[%s5519_s1 + $0x630] ss:$8 sps:$4 sm:$0xff]  }
  0x99   :  { %2650 = vmatprep.subr.bf16.mxu1 %v3797_v41  ;;  %v3883_v41 = vld [vmem:[%s5519_s1 + $0x730] ss:$8 sps:$4 sm:$0xff]  }
  0x9b   :  { %2610 = vmatpush1.bf16.msra.mxu0 %v3792_v42  ;;  %v3888_v42 = vld [vmem:[%s5519_s1 + $0x624] ss:$8 sps:$4 sm:$0xff]  }
  0x9c   :  { %2651 = vmatpush1.bf16.msra.mxu1 %v3795_v43  ;;  %2611 = vmatprep.subr.bf16.mxu0 %v3800_v44  ;;  %v3891_v43 = vld [vmem:[%s5519_s1 + $0x724] ss:$8 sps:$4 sm:$0xff]   ;;  %v3886_v44 = vld [vmem:[%s5519_s1 + $0x620] ss:$8 sps:$4 sm:$0xff]  }
  0x9d   :  { %2652 = vmatprep.subr.bf16.mxu1 %v3803_v45  ;;  %v3889_v45 = vld [vmem:[%s5519_s1 + $0x720] ss:$8 sps:$4 sm:$0xff]  }
  0x9f   :  { %2612 = vmatpush1.bf16.msra.mxu0 %v3798_v46  ;;  %v3894_v46 = vld [vmem:[%s5519_s1 + $0x614] ss:$8 sps:$4 sm:$0xff]  }
  0xa0   :  { %2653 = vmatpush1.bf16.msra.mxu1 %v3801_v47  ;;  %2613 = vmatprep.subr.bf16.mxu0 %v3806_v48  ;;  %v3897_v47 = vld [vmem:[%s5519_s1 + $0x714] ss:$8 sps:$4 sm:$0xff]   ;;  %v3892_v48 = vld [vmem:[%s5519_s1 + $0x610] ss:$8 sps:$4 sm:$0xff]  }
  0xa1   :  { %2654 = vmatprep.subr.bf16.mxu1 %v3809_v49  ;;  %v3895_v49 = vld [vmem:[%s5519_s1 + $0x710] ss:$8 sps:$4 sm:$0xff]  }
  0xa3   :  { %2614 = vmatpush2.bf16.msra.mxu0 %v3804_v50  ;;  %v3900_v50 = vld [vmem:[%s5519_s1 + $0x604] ss:$8 sps:$4 sm:$0xff]  }
  0xa4   :  { %2655 = vmatpush2.bf16.msra.mxu1 %v3807_v51  ;;  %2615 = vmatprep.subr.bf16.mxu0 %v3812_v52  ;;  %v3903_v51 = vld [vmem:[%s5519_s1 + $0x704] ss:$8 sps:$4 sm:$0xff]   ;;  %v3898_v52 = vld [vmem:[%s5519_s1 + $0x600] ss:$8 sps:$4 sm:$0xff]  }
  0xa5   :  { %2656 = vmatprep.subr.bf16.mxu1 %v3815_v53  ;;  %v3901_v53 = vld [vmem:[%s5519_s1 + $0x700] ss:$8 sps:$4 sm:$0xff]  }
  0xa7   :  { %2616 = vmatpush2.bf16.msra.mxu0 %v3810_v54  ;;  %v3906_v54 = vld [vmem:[%s5519_s1 + $0x6f4] ss:$8 sps:$4 sm:$0xff]  }
  0xa8   :  { %2657 = vmatpush2.bf16.msra.mxu1 %v3813_v55  ;;  %2617 = vmatprep.subr.bf16.mxu0 %v3818_v56  ;;  %v3909_v55 = vld [vmem:[%s5519_s1 + $0x7f4] ss:$8 sps:$4 sm:$0xff]   ;;  %v3904_v56 = vld [vmem:[%s5519_s1 + $0x6f0] ss:$8 sps:$4 sm:$0xff]  }
  0xa9   :  { %2658 = vmatprep.subr.bf16.mxu1 %v3821_v57  ;;  %v3907_v57 = vld [vmem:[%s5519_s1 + $0x7f0] ss:$8 sps:$4 sm:$0xff]  }
  0xab   :  { %2618 = vmatpush2.bf16.msra.mxu0 %v3816_v58  ;;  %v3912_v58 = vld [vmem:[%s5519_s1 + $0x6e4] ss:$8 sps:$4 sm:$0xff]  }
  0xac   :  { %2659 = vmatpush2.bf16.msra.mxu1 %v3819_v59  ;;  %2619 = vmatprep.subr.bf16.mxu0 %v3824_v60  ;;  %v3915_v59 = vld [vmem:[%s5519_s1 + $0x7e4] ss:$8 sps:$4 sm:$0xff]   ;;  %v3910_v60 = vld [vmem:[%s5519_s1 + $0x6e0] ss:$8 sps:$4 sm:$0xff]  }
  0xad   :  { %2660 = vmatprep.subr.bf16.mxu1 %v3827_v61  ;;  %v3913_v61 = vld [vmem:[%s5519_s1 + $0x7e0] ss:$8 sps:$4 sm:$0xff]  }
  0xaf   :  { %2620 = vmatpush2.bf16.msra.mxu0 %v3822_v62  ;;  %v3918_v62 = vld [vmem:[%s5519_s1 + $0x6d4] ss:$8 sps:$4 sm:$0xff]  }
  0xb0   :  { %2661 = vmatpush2.bf16.msra.mxu1 %v3825_v63  ;;  %2621 = vmatprep.subr.bf16.mxu0 %v3830_v0  ;;  %v3921_v63 = vld [vmem:[%s5519_s1 + $0x7d4] ss:$8 sps:$4 sm:$0xff]   ;;  %v3916_v0 = vld [vmem:[%s5519_s1 + $0x6d0] ss:$8 sps:$4 sm:$0xff]  }
  0xb1   :  { %2662 = vmatprep.subr.bf16.mxu1 %v3833_v1  ;;  %v3919_v1 = vld [vmem:[%s5519_s1 + $0x7d0] ss:$8 sps:$4 sm:$0xff]  }
  0xb3   :  { %2622 = vmatpush2.bf16.msra.mxu0 %v3828_v2  ;;  %v3924_v2 = vld [vmem:[%s5519_s1 + $0x6c4] ss:$8 sps:$4 sm:$0xff]  }
  0xb4   :  { %2663 = vmatpush2.bf16.msra.mxu1 %v3831_v3  ;;  %2623 = vmatprep.subr.bf16.mxu0 %v3836_v4  ;;  %v3927_v3 = vld [vmem:[%s5519_s1 + $0x7c4] ss:$8 sps:$4 sm:$0xff]   ;;  %v3922_v4 = vld [vmem:[%s5519_s1 + $0x6c0] ss:$8 sps:$4 sm:$0xff]  }
  0xb5   :  { %2664 = vmatprep.subr.bf16.mxu1 %v3839_v5  ;;  %v3925_v5 = vld [vmem:[%s5519_s1 + $0x7c0] ss:$8 sps:$4 sm:$0xff]  }
  0xb7   :  { %2624 = vmatpush2.bf16.msra.mxu0 %v3834_v6  ;;  %v3930_v6 = vld [vmem:[%s5519_s1 + $0x6b4] ss:$8 sps:$4 sm:$0xff]  }
  0xb8   :  { %2665 = vmatpush2.bf16.msra.mxu1 %v3837_v7  ;;  %2625 = vmatprep.subr.bf16.mxu0 %v3842_v8  ;;  %v3933_v7 = vld [vmem:[%s5519_s1 + $0x7b4] ss:$8 sps:$4 sm:$0xff]   ;;  %v3928_v8 = vld [vmem:[%s5519_s1 + $0x6b0] ss:$8 sps:$4 sm:$0xff]  }
  0xb9   :  { %2666 = vmatprep.subr.bf16.mxu1 %v3845_v9  ;;  %v3931_v9 = vld [vmem:[%s5519_s1 + $0x7b0] ss:$8 sps:$4 sm:$0xff]  }
  0xbb   :  { %2626 = vmatpush2.bf16.msra.mxu0 %v3840_v10  ;;  %v3936_v10 = vld [vmem:[%s5519_s1 + $0x6a4] ss:$8 sps:$4 sm:$0xff]  }
  0xbc   :  { %2667 = vmatpush2.bf16.msra.mxu1 %v3843_v11  ;;  %2627 = vmatprep.subr.bf16.mxu0 %v3848_v12  ;;  %v3939_v11 = vld [vmem:[%s5519_s1 + $0x7a4] ss:$8 sps:$4 sm:$0xff]   ;;  %v3934_v12 = vld [vmem:[%s5519_s1 + $0x6a0] ss:$8 sps:$4 sm:$0xff]  }
  0xbd   :  { %2668 = vmatprep.subr.bf16.mxu1 %v3851_v13  ;;  %v3937_v13 = vld [vmem:[%s5519_s1 + $0x7a0] ss:$8 sps:$4 sm:$0xff]  }
  0xbf   :  { %2628 = vmatpush2.bf16.msra.mxu0 %v3846_v14  ;;  %v3942_v14 = vld [vmem:[%s5519_s1 + $0x694] ss:$8 sps:$4 sm:$0xff]  }
  0xc0   :  { %2669 = vmatpush2.bf16.msra.mxu1 %v3849_v15  ;;  %2679 = vmatprep.subr.bf16.mxu0 %v3858_v16  ;;  %v419_v15 = vlaneseq  ;;  %v3945_v16 = vld [vmem:[%s5519_s1 + $0x794] ss:$8 sps:$4 sm:$0xff]  }
  0xc1   :  { %2720 = vmatprep.subr.bf16.mxu1 %v3861_v17  ;;  %v3940_v17 = vld [vmem:[%s5519_s1 + $0x690] ss:$8 sps:$4 sm:$0xff]  }
  0xc2   :  { %2630 = vmatmul.mubr.bf16.vlgmr.msra.gmra.mxu0 %v3117_v22  ;;  %v3948_v22 = vld [vmem:[%s5519_s1 + $0x684] ss:$8 sps:$4 sm:$0xff]  }
  0xc3   :  { %2671 = vmatmul.mubr.bf16.vlgmr.msra.gmra.mxu1 %v3119_v23  ;;  %2680 = vmatpush1.bf16.msra.mxu0 %v3856_v20  ;;  %v3943_v20 = vld [vmem:[%s5519_s1 + $0x790] ss:$8 sps:$4 sm:$0xff]   ;;  %v420_v23 = vshrl.u32 %v419_v15, 7  ;;  %v4006_v15 = vld [vmem:[%s5519_s1 + $0x8f4] ss:$8 sps:$4 sm:$0xff]  }
  0xc4   :  { %2721 = vmatpush1.bf16.msra.mxu1 %v3859_v25  ;;  %2681 = vmatprep.subr.bf16.mxu0 %v3864_v18  ;;  %v3951_v25 = vld [vmem:[%s5519_s1 + $0x784] ss:$8 sps:$4 sm:$0xff]   ;;  %v3946_v18 = vld [vmem:[%s5519_s1 + $0x680] ss:$8 sps:$4 sm:$0xff]  }
  0xc5   :  { %2722 = vmatprep.subr.bf16.mxu1 %v3867_v19  ;;  %2711 = vmatprep.mubr.bf16.mxu0 %v3122_v26  ;;  %v3949_v19 = vld [vmem:[%s5519_s1 + $0x780] ss:$8 sps:$4 sm:$0xff]  }
  0xc6   :  { %2752 = vmatprep.mubr.bf16.mxu1 %v3124_v27  ;;  %v417_v26 = vld [vmem:[%s5521_s2] sm:$0x3]  ;;  %v421_v27 = vsub.s32 0, %v420_v23 }
  0xc7   :  { %2682 = vmatpush1.bf16.msra.mxu0 %v3862_v28  ;;  %v3958_v28 = vld [vmem:[%s5519_s1 + $0x874] ss:$8 sps:$4 sm:$0xff]  }
  0xc8   :  { %2723 = vmatpush1.bf16.msra.mxu1 %v3865_v29  ;;  %2683 = vmatprep.subr.bf16.mxu0 %v3870_v30  ;;  %v3961_v29 = vld [vmem:[%s5519_s1 + $0x974] ss:$8 sps:$4 sm:$0xff]   ;;  %v3956_v30 = vld [vmem:[%s5519_s1 + $0x870] ss:$8 sps:$4 sm:$0xff]  }
  0xc9   :  { %2724 = vmatprep.subr.bf16.mxu1 %v3873_v31  ;;  %v425_v31 = vsub.s32 1, %v420_v23  ;;  %v4015_v23 = vld [vmem:[%s5519_s1 + $0x9e4] ss:$8 sps:$4 sm:$0xff]  }
  0xcb   :  { %2684 = vmatpush1.bf16.msra.mxu0 %v3868_v32  ;;  %v3121_v32 = vcombine.low %v4828_v21, %v4828_v21  ;;  %v3959_v21 = vld [vmem:[%s5519_s1 + $0x970] ss:$8 sps:$4 sm:$0xff]  }
  0xcc   :  { %2725 = vmatpush1.bf16.msra.mxu1 %v3871_v33  ;;  %2685 = vmatprep.subr.bf16.mxu0 %v3876_v34  ;;  %v3123_v33 = vcombine.low %v4837_v24, %v4837_v24  ;;  %v5045_v34 = vld [vmem:[%s5520_s0 + $0x40] sm:$0xff] }
  0xcd   :  { %2726 = vmatprep.subr.bf16.mxu1 %v3879_v35  ;;  %v5050_v35 = vld [vmem:[%s5520_s0 + $0x48] sm:$0xff] }
  0xce   :  { %v3964_v24 = vld [vmem:[%s5519_s1 + $0x864] ss:$8 sps:$4 sm:$0xff]  }
  0xcf   :  { %2686 = vmatpush1.bf16.msra.mxu0 %v3874_v36  ;;  %v422_v36 = vrot.slane %v417_v26, %v421_v27  ;;  %v4016_v27 = vld [vmem:[%s5519_s1 + $0x8d0] ss:$8 sps:$4 sm:$0xff]  }
  0xd0   :  { %2727 = vmatpush1.bf16.msra.mxu1 %v3877_v37  ;;  %2687 = vmatprep.subr.bf16.mxu0 %v3882_v38  ;;  %v3967_v37 = vld [vmem:[%s5519_s1 + $0x964] ss:$8 sps:$4 sm:$0xff]   ;;  %v426_v38 = vrot.slane %v417_v26, %v425_v31  ;;  %v4021_v26 = vld [vmem:[%s5519_s1 + $0x9d4] ss:$8 sps:$4 sm:$0xff]   ;;  %v4022_v31 = vld [vmem:[%s5519_s1 + $0x8c0] ss:$8 sps:$4 sm:$0xff]  }
  0xd1   :  { %2728 = vmatprep.subr.bf16.mxu1 %v3885_v39  ;;  %v3126_v39 = vcombine.high %v5045_v34, %v5045_v34 }
  0xd3   :  { %2688 = vmatpush1.bf16.msra.mxu0 %v3880_v40  ;;  %v3128_v40 = vcombine.high %v5050_v35, %v5050_v35 }
  0xd4   :  { %2729 = vmatpush1.bf16.msra.mxu1 %v3883_v41  ;;  %2689 = vmatprep.subr.bf16.mxu0 %v3888_v42 }
  0xd5   :  { %2730 = vmatprep.subr.bf16.mxu1 %v3891_v43 }
  0xd7   :  { %2690 = vmatpush1.bf16.msra.mxu0 %v3886_v44  ;;  %v3962_v44 = vld [vmem:[%s5519_s1 + $0x860] ss:$8 sps:$4 sm:$0xff]  }
  0xd8   :  { %2731 = vmatpush1.bf16.msra.mxu1 %v3889_v45  ;;  %2691 = vmatprep.subr.bf16.mxu0 %v3894_v46  ;;  %v3965_v45 = vld [vmem:[%s5519_s1 + $0x960] ss:$8 sps:$4 sm:$0xff]  }
  0xd9   :  { %2732 = vmatprep.subr.bf16.mxu1 %v3897_v47 }
  0xdb   :  { %2692 = vmatpush1.bf16.msra.mxu0 %v3892_v48  ;;  %v3970_v48 = vld [vmem:[%s5519_s1 + $0x854] ss:$8 sps:$4 sm:$0xff]  }
  0xdc   :  { %2733 = vmatpush1.bf16.msra.mxu1 %v3895_v49  ;;  %2693 = vmatprep.subr.bf16.mxu0 %v3900_v50  ;;  %v3973_v49 = vld [vmem:[%s5519_s1 + $0x954] ss:$8 sps:$4 sm:$0xff]  }
  0xdd   :  { %2734 = vmatprep.subr.bf16.mxu1 %v3903_v51 }
  0xdf   :  { %2694 = vmatpush1.bf16.msra.mxu0 %v3898_v52 }
  0xe0   :  { %2735 = vmatpush1.bf16.msra.mxu1 %v3901_v53  ;;  %2695 = vmatprep.subr.bf16.mxu0 %v3906_v54 }
  0xe1   :  { %2736 = vmatprep.subr.bf16.mxu1 %v3909_v55  ;;  %v3968_v55 = vld [vmem:[%s5519_s1 + $0x850] ss:$8 sps:$4 sm:$0xff]  }
  0xe3   :  { %2696 = vmatpush2.bf16.msra.mxu0 %v3904_v56  ;;  %v3971_v56 = vld [vmem:[%s5519_s1 + $0x950] ss:$8 sps:$4 sm:$0xff]  }
  0xe4   :  { %2737 = vmatpush2.bf16.msra.mxu1 %v3907_v57  ;;  %2697 = vmatprep.subr.bf16.mxu0 %v3912_v58 }
  0xe5   :  { %2738 = vmatprep.subr.bf16.mxu1 %v3915_v59  ;;  %v3976_v59 = vld [vmem:[%s5519_s1 + $0x844] ss:$8 sps:$4 sm:$0xff]  }
  0xe7   :  { %2698 = vmatpush2.bf16.msra.mxu0 %v3910_v60  ;;  %v3979_v60 = vld [vmem:[%s5519_s1 + $0x944] ss:$8 sps:$4 sm:$0xff]  }
  0xe8   :  { %2739 = vmatpush2.bf16.msra.mxu1 %v3913_v61  ;;  %2699 = vmatprep.subr.bf16.mxu0 %v3918_v62  ;;  %v3974_v61 = vld [vmem:[%s5519_s1 + $0x840] ss:$8 sps:$4 sm:$0xff]  }
  0xe9   :  { %2740 = vmatprep.subr.bf16.mxu1 %v3921_v63  ;;  %v3977_v62 = vld [vmem:[%s5519_s1 + $0x940] ss:$8 sps:$4 sm:$0xff]   ;;  %v3982_v63 = vld [vmem:[%s5519_s1 + $0x834] ss:$8 sps:$4 sm:$0xff]  }
  0xeb   :  { %2700 = vmatpush2.bf16.msra.mxu0 %v3916_v0  ;;  %v3985_v0 = vld [vmem:[%s5519_s1 + $0x934] ss:$8 sps:$4 sm:$0xff]  }
  0xec   :  { %2741 = vmatpush2.bf16.msra.mxu1 %v3919_v1  ;;  %2701 = vmatprep.subr.bf16.mxu0 %v3924_v2  ;;  %v3980_v1 = vld [vmem:[%s5519_s1 + $0x830] ss:$8 sps:$4 sm:$0xff]  }
  0xed   :  { %2742 = vmatprep.subr.bf16.mxu1 %v3927_v3  ;;  %v3983_v2 = vld [vmem:[%s5519_s1 + $0x930] ss:$8 sps:$4 sm:$0xff]   ;;  %v3988_v3 = vld [vmem:[%s5519_s1 + $0x824] ss:$8 sps:$4 sm:$0xff]  }
  0xef   :  { %2702 = vmatpush2.bf16.msra.mxu0 %v3922_v4  ;;  %v3991_v4 = vld [vmem:[%s5519_s1 + $0x924] ss:$8 sps:$4 sm:$0xff]  }
  0xf0   :  { %2743 = vmatpush2.bf16.msra.mxu1 %v3925_v5  ;;  %2703 = vmatprep.subr.bf16.mxu0 %v3930_v6  ;;  %v3986_v5 = vld [vmem:[%s5519_s1 + $0x820] ss:$8 sps:$4 sm:$0xff]  }
  0xf1   :  { %2744 = vmatprep.subr.bf16.mxu1 %v3933_v7  ;;  %v3989_v6 = vld [vmem:[%s5519_s1 + $0x920] ss:$8 sps:$4 sm:$0xff]   ;;  %v3994_v7 = vld [vmem:[%s5519_s1 + $0x814] ss:$8 sps:$4 sm:$0xff]  }
  0xf3   :  { %2704 = vmatpush2.bf16.msra.mxu0 %v3928_v8  ;;  %v3997_v8 = vld [vmem:[%s5519_s1 + $0x914] ss:$8 sps:$4 sm:$0xff]  }
  0xf4   :  { %2745 = vmatpush2.bf16.msra.mxu1 %v3931_v9  ;;  %2705 = vmatprep.subr.bf16.mxu0 %v3936_v10  ;;  %v3992_v9 = vld [vmem:[%s5519_s1 + $0x810] ss:$8 sps:$4 sm:$0xff]  }
  0xf5   :  { %2746 = vmatprep.subr.bf16.mxu1 %v3939_v11  ;;  %v3995_v10 = vld [vmem:[%s5519_s1 + $0x910] ss:$8 sps:$4 sm:$0xff]   ;;  %v4000_v11 = vld [vmem:[%s5519_s1 + $0x804] ss:$8 sps:$4 sm:$0xff]  }
  0xf7   :  { %2706 = vmatpush2.bf16.msra.mxu0 %v3934_v12  ;;  %v4003_v12 = vld [vmem:[%s5519_s1 + $0x904] ss:$8 sps:$4 sm:$0xff]  }
  0xf8   :  { %2747 = vmatpush2.bf16.msra.mxu1 %v3937_v13  ;;  %2707 = vmatprep.subr.bf16.mxu0 %v3942_v14  ;;  %v3998_v13 = vld [vmem:[%s5519_s1 + $0x800] ss:$8 sps:$4 sm:$0xff]  }
  0xf9   :  { %2748 = vmatprep.subr.bf16.mxu1 %v3945_v16  ;;  %v4001_v14 = vld [vmem:[%s5519_s1 + $0x900] ss:$8 sps:$4 sm:$0xff]   ;;  %v4009_v16 = vld [vmem:[%s5519_s1 + $0x9f4] ss:$8 sps:$4 sm:$0xff]  }
  0xfb   :  { %2708 = vmatpush2.bf16.msra.mxu0 %v3940_v17  ;;  %v4004_v17 = vld [vmem:[%s5519_s1 + $0x8f0] ss:$8 sps:$4 sm:$0xff]  }
  0xfc   :  { %2749 = vmatpush2.bf16.msra.mxu1 %v3943_v20  ;;  %2709 = vmatprep.subr.bf16.mxu0 %v3948_v22  ;;  %v4007_v20 = vld [vmem:[%s5519_s1 + $0x9f0] ss:$8 sps:$4 sm:$0xff]   ;;  %v4012_v22 = vld [vmem:[%s5519_s1 + $0x8e4] ss:$8 sps:$4 sm:$0xff]  }
  0xfd   :  { %2750 = vmatprep.subr.bf16.mxu1 %v3951_v25  ;;  %v4010_v25 = vld [vmem:[%s5519_s1 + $0x8e0] ss:$8 sps:$4 sm:$0xff]  }
  0xff   :  { %2710 = vmatpush2.bf16.msra.mxu0 %v3946_v18  ;;  %v4013_v18 = vld [vmem:[%s5519_s1 + $0x9e0] ss:$8 sps:$4 sm:$0xff]  }
 0x100   :  { %2751 = vmatpush2.bf16.msra.mxu1 %v3949_v19  ;;  %2761 = vmatprep.subr.bf16.mxu0 %v3958_v28  ;;  %v4018_v19 = vld [vmem:[%s5519_s1 + $0x8d4] ss:$8 sps:$4 sm:$0xff]   ;;  %v4019_v28 = vld [vmem:[%s5519_s1 + $0x9d0] ss:$8 sps:$4 sm:$0xff]  }
 0x101   :  { %2802 = vmatprep.subr.bf16.mxu1 %v3961_v29  ;;  %v4024_v29 = vld [vmem:[%s5519_s1 + $0x8c4] ss:$8 sps:$4 sm:$0xff]  }
 0x102   :  { %v2467_v41 = vpop.f32.mrf.mxu0  ;;  %2712 = vmatmul.mubr.bf16.vlgmr.msra.gmra.mxu0 %v3121_v32  ;;  %v4025_v32 = vld [vmem:[%s5519_s1 + $0x9c0] ss:$8 sps:$4 sm:$0xff]  }
 0x103   :  { %v2508_v42 = vpop.f32.mrf.mxu1  ;;  %2753 = vmatmul.mubr.bf16.vlgmr.msra.gmra.mxu1 %v3123_v33  ;;  %v2468_v43 = vadd.f32 %v2467_v41, %v422_v36  ;;  %2762 = vmatpush1.bf16.msra.mxu0 %v3956_v30  ;;  %v4027_v30 = vld [vmem:[%s5519_s1 + $0x9c4] ss:$8 sps:$4 sm:$0xff]   ;;  %v4030_v33 = vld [vmem:[%s5519_s1 + $0x8b4] ss:$8 sps:$4 sm:$0xff]  }
 0x104   :  { %2803 = vmatpush1.bf16.msra.mxu1 %v3959_v21  ;;  %v2469_v46 = vpop.f32.mrf.mxu0  ;;  %2763 = vmatprep.subr.bf16.mxu0 %v3964_v24  ;;  %v4033_v36 = vld [vmem:[%s5519_s1 + $0x9b4] ss:$8 sps:$4 sm:$0xff]   ;;  %v4028_v21 = vld [vmem:[%s5519_s1 + $0x8b0] ss:$8 sps:$4 sm:$0xff]  }
 0x105   :  { %v2510_v47 = vpop.f32.mrf.mxu1  ;;  %2804 = vmatprep.subr.bf16.mxu1 %v3967_v37  ;;  %v5077_v50 = vadd.f32 %v2508_v42, %v2468_v43  ;;  %v2470_v51 = vadd.f32 %v2469_v46, %v426_v38  ;;  %2793 = vmatprep.mubr.bf16.mxu0 %v3126_v39  ;;  %v4031_v24 = vld [vmem:[%s5519_s1 + $0x9b0] ss:$8 sps:$4 sm:$0xff]   ;;  %v4036_v37 = vld [vmem:[%s5519_s1 + $0x8a4] ss:$8 sps:$4 sm:$0xff]   ;;  %v4034_v39 = vld [vmem:[%s5519_s1 + $0x8a0] ss:$8 sps:$4 sm:$0xff]  }
 0x106   :  { %2834 = vmatprep.mubr.bf16.mxu1 %v3128_v40  ;;  %v2471_v52 = vpop.f32.mrf.mxu0  ;;  %v4039_v38 = vld [vmem:[%s5519_s1 + $0x9a4] ss:$8 sps:$4 sm:$0xff]   ;;  %v4037_v40 = vld [vmem:[%s5519_s1 + $0x9a0] ss:$8 sps:$4 sm:$0xff]   ;;  %v4042_v41 = vld [vmem:[%s5519_s1 + $0x894] ss:$8 sps:$4 sm:$0xff]  }
 0x107   :  { %v2512_v53 = vpop.f32.mrf.mxu1  ;;  %v5079_v54 = vadd.f32 %v2510_v47, %v2470_v51  ;;  %2764 = vmatpush1.bf16.msra.mxu0 %v3962_v44  ;;  %v4045_v42 = vld [vmem:[%s5519_s1 + $0x994] ss:$8 sps:$4 sm:$0xff]   ;;  %v4040_v43 = vld [vmem:[%s5519_s1 + $0x890] ss:$8 sps:$4 sm:$0xff]   ;;  %v4051_v46 = vld [vmem:[%s5519_s1 + $0x984] ss:$8 sps:$4 sm:$0xff]   ;;  %v3125_v52 = vcombine.low %v5045_v34, %v5045_v34 }
 0x108   :  { %2805 = vmatpush1.bf16.msra.mxu1 %v3965_v45  ;;  %v2472_v57 = vpop.f32.mrf.mxu0  ;;  %2765 = vmatprep.subr.bf16.mxu0 %v3970_v48  ;;  %v4043_v44 = vld [vmem:[%s5519_s1 + $0x990] ss:$8 sps:$4 sm:$0xff]   ;;  %v4048_v45 = vld [vmem:[%s5519_s1 + $0x884] ss:$8 sps:$4 sm:$0xff]   ;;  %v4046_v47 = vld [vmem:[%s5519_s1 + $0x880] ss:$8 sps:$4 sm:$0xff]   ;;  %v3127_v53 = vcombine.low %v5050_v35, %v5050_v35 }
 0x109   :  { %v2513_v58 = vpop.f32.mrf.mxu1  ;;  %2806 = vmatprep.subr.bf16.mxu1 %v3973_v49  ;;  %v4049_v48 = vld [vmem:[%s5519_s1 + $0x980] ss:$8 sps:$4 sm:$0xff]   ;;  %v4058_v49 = vld [vmem:[%s5519_s1 + $0xa74] ss:$8 sps:$4 sm:$0xff]   ;;  %v4056_v57 = vld [vmem:[%s5519_s1 + $0xa70] ss:$8 sps:$4 sm:$0xff]  }
 0x10a   :  { %v4061_v51 = vld [vmem:[%s5519_s1 + $0xb74] ss:$8 sps:$4 sm:$0xff]   ;;  %v4059_v34 = vld [vmem:[%s5519_s1 + $0xb70] ss:$8 sps:$4 sm:$0xff]   ;;  %v4064_v35 = vld [vmem:[%s5519_s1 + $0xa64] ss:$8 sps:$4 sm:$0xff]  }
 0x10b   :  { %2766 = vmatpush1.bf16.msra.mxu0 %v3968_v55  ;;  %v5256_v55 = vld [vmem:[%s5520_s0 + $0x50] sm:$0xff]  ;;  %v4067_v58 = vld [vmem:[%s5519_s1 + $0xb64] ss:$8 sps:$4 sm:$0xff]  }
 0x10c   :  { %2807 = vmatpush1.bf16.msra.mxu1 %v3971_v56  ;;  %2767 = vmatprep.subr.bf16.mxu0 %v3976_v59  ;;  %v5261_v56 = vld [vmem:[%s5520_s0 + $0x58] sm:$0xff]  ;;  %v3130_v59 = vcombine.high %v5256_v55, %v5256_v55 }
 0x10d   :  { %2808 = vmatprep.subr.bf16.mxu1 %v3979_v60  ;;  %v3132_v60 = vcombine.high %v5261_v56, %v5261_v56 }
 0x10f   :  { %2768 = vmatpush1.bf16.msra.mxu0 %v3974_v61 }
 0x110   :  { %2809 = vmatpush1.bf16.msra.mxu1 %v3977_v62  ;;  %2769 = vmatprep.subr.bf16.mxu0 %v3982_v63 }
 0x111   :  { %2810 = vmatprep.subr.bf16.mxu1 %v3985_v0  ;;  %v4062_v0 = vld [vmem:[%s5519_s1 + $0xa60] ss:$8 sps:$4 sm:$0xff]  }
 0x113   :  { %2770 = vmatpush1.bf16.msra.mxu0 %v3980_v1  ;;  %v4065_v1 = vld [vmem:[%s5519_s1 + $0xb60] ss:$8 sps:$4 sm:$0xff]  }
 0x114   :  { %2811 = vmatpush1.bf16.msra.mxu1 %v3983_v2  ;;  %2771 = vmatprep.subr.bf16.mxu0 %v3988_v3 }
 0x115   :  { %2812 = vmatprep.subr.bf16.mxu1 %v3991_v4  ;;  %v4070_v4 = vld [vmem:[%s5519_s1 + $0xa54] ss:$8 sps:$4 sm:$0xff]  }
 0x117   :  { %2772 = vmatpush1.bf16.msra.mxu0 %v3986_v5 }
 0x118   :  { %2813 = vmatpush1.bf16.msra.mxu1 %v3989_v6  ;;  %2773 = vmatprep.subr.bf16.mxu0 %v3994_v7 }
 0x119   :  { %2814 = vmatprep.subr.bf16.mxu1 %v3997_v8 }
 0x11b   :  { %2774 = vmatpush1.bf16.msra.mxu0 %v3992_v9 }
 0x11c   :  { %2815 = vmatpush1.bf16.msra.mxu1 %v3995_v10  ;;  %2775 = vmatprep.subr.bf16.mxu0 %v4000_v11  ;;  %v4068_v10 = vld [vmem:[%s5519_s1 + $0xa50] ss:$8 sps:$4 sm:$0xff]  }
 0x11d   :  { %2816 = vmatprep.subr.bf16.mxu1 %v4003_v12  ;;  %v4071_v11 = vld [vmem:[%s5519_s1 + $0xb50] ss:$8 sps:$4 sm:$0xff]  }
 0x11f   :  { %2776 = vmatpush1.bf16.msra.mxu0 %v3998_v13 }
 0x120   :  { %2817 = vmatpush1.bf16.msra.mxu1 %v4001_v14  ;;  %2777 = vmatprep.subr.bf16.mxu0 %v4006_v15  ;;  %v4079_v14 = vld [vmem:[%s5519_s1 + $0xb44] ss:$8 sps:$4 sm:$0xff]   ;;  %v4074_v15 = vld [vmem:[%s5519_s1 + $0xa40] ss:$8 sps:$4 sm:$0xff]  }
 0x121   :  { %2818 = vmatprep.subr.bf16.mxu1 %v4009_v16  ;;  %v4077_v16 = vld [vmem:[%s5519_s1 + $0xb40] ss:$8 sps:$4 sm:$0xff]  }
 0x123   :  { %2778 = vmatpush2.bf16.msra.mxu0 %v4004_v17  ;;  %v4082_v17 = vld [vmem:[%s5519_s1 + $0xa34] ss:$8 sps:$4 sm:$0xff]  }
 0x124   :  { %2819 = vmatpush2.bf16.msra.mxu1 %v4007_v20  ;;  %2779 = vmatprep.subr.bf16.mxu0 %v4012_v22  ;;  %v4085_v20 = vld [vmem:[%s5519_s1 + $0xb34] ss:$8 sps:$4 sm:$0xff]   ;;  %v4080_v22 = vld [vmem:[%s5519_s1 + $0xa30] ss:$8 sps:$4 sm:$0xff]  }
 0x125   :  { %2820 = vmatprep.subr.bf16.mxu1 %v4015_v23  ;;  %v4083_v23 = vld [vmem:[%s5519_s1 + $0xb30] ss:$8 sps:$4 sm:$0xff]  }
 0x127   :  { %2780 = vmatpush2.bf16.msra.mxu0 %v4010_v25  ;;  %v4088_v25 = vld [vmem:[%s5519_s1 + $0xa24] ss:$8 sps:$4 sm:$0xff]  }
 0x128   :  { %2821 = vmatpush2.bf16.msra.mxu1 %v4013_v18  ;;  %2781 = vmatprep.subr.bf16.mxu0 %v4018_v19  ;;  %v4091_v18 = vld [vmem:[%s5519_s1 + $0xb24] ss:$8 sps:$4 sm:$0xff]   ;;  %v4086_v19 = vld [vmem:[%s5519_s1 + $0xa20] ss:$8 sps:$4 sm:$0xff]  }
 0x129   :  { %2822 = vmatprep.subr.bf16.mxu1 %v4021_v26  ;;  %v4089_v26 = vld [vmem:[%s5519_s1 + $0xb20] ss:$8 sps:$4 sm:$0xff]  }
 0x12b   :  { %2782 = vmatpush2.bf16.msra.mxu0 %v4016_v27  ;;  %v4094_v27 = vld [vmem:[%s5519_s1 + $0xa14] ss:$8 sps:$4 sm:$0xff]  }
 0x12c   :  { %2823 = vmatpush2.bf16.msra.mxu1 %v4019_v28  ;;  %2783 = vmatprep.subr.bf16.mxu0 %v4024_v29  ;;  %v4097_v28 = vld [vmem:[%s5519_s1 + $0xb14] ss:$8 sps:$4 sm:$0xff]   ;;  %v4092_v29 = vld [vmem:[%s5519_s1 + $0xa10] ss:$8 sps:$4 sm:$0xff]  }
 0x12d   :  { %2824 = vmatprep.subr.bf16.mxu1 %v4027_v30  ;;  %v4095_v30 = vld [vmem:[%s5519_s1 + $0xb10] ss:$8 sps:$4 sm:$0xff]  }
 0x12f   :  { %2784 = vmatpush2.bf16.msra.mxu0 %v4022_v31  ;;  %v4100_v31 = vld [vmem:[%s5519_s1 + $0xa04] ss:$8 sps:$4 sm:$0xff]  }
 0x130   :  { %2825 = vmatpush2.bf16.msra.mxu1 %v4025_v32  ;;  %2785 = vmatprep.subr.bf16.mxu0 %v4030_v33  ;;  %v4103_v32 = vld [vmem:[%s5519_s1 + $0xb04] ss:$8 sps:$4 sm:$0xff]   ;;  %v4098_v33 = vld [vmem:[%s5519_s1 + $0xa00] ss:$8 sps:$4 sm:$0xff]  }
 0x131   :  { %2826 = vmatprep.subr.bf16.mxu1 %v4033_v36  ;;  %v4101_v36 = vld [vmem:[%s5519_s1 + $0xb00] ss:$8 sps:$4 sm:$0xff]  }
 0x133   :  { %2786 = vmatpush2.bf16.msra.mxu0 %v4028_v21  ;;  %v4106_v21 = vld [vmem:[%s5519_s1 + $0xaf4] ss:$8 sps:$4 sm:$0xff]  }
 0x134   :  { %2827 = vmatpush2.bf16.msra.mxu1 %v4031_v24  ;;  %2787 = vmatprep.subr.bf16.mxu0 %v4036_v37  ;;  %v4109_v24 = vld [vmem:[%s5519_s1 + $0xbf4] ss:$8 sps:$4 sm:$0xff]   ;;  %v4104_v37 = vld [vmem:[%s5519_s1 + $0xaf0] ss:$8 sps:$4 sm:$0xff]  }
 0x135   :  { %2828 = vmatprep.subr.bf16.mxu1 %v4039_v38  ;;  %v4107_v38 = vld [vmem:[%s5519_s1 + $0xbf0] ss:$8 sps:$4 sm:$0xff]  }
 0x137   :  { %2788 = vmatpush2.bf16.msra.mxu0 %v4034_v39  ;;  %v4112_v39 = vld [vmem:[%s5519_s1 + $0xae4] ss:$8 sps:$4 sm:$0xff]  }
 0x138   :  { %2829 = vmatpush2.bf16.msra.mxu1 %v4037_v40  ;;  %2789 = vmatprep.subr.bf16.mxu0 %v4042_v41  ;;  %v4115_v40 = vld [vmem:[%s5519_s1 + $0xbe4] ss:$8 sps:$4 sm:$0xff]   ;;  %v4110_v41 = vld [vmem:[%s5519_s1 + $0xae0] ss:$8 sps:$4 sm:$0xff]  }
 0x139   :  { %2830 = vmatprep.subr.bf16.mxu1 %v4045_v42  ;;  %v4113_v42 = vld [vmem:[%s5519_s1 + $0xbe0] ss:$8 sps:$4 sm:$0xff]  }
 0x13b   :  { %2790 = vmatpush2.bf16.msra.mxu0 %v4040_v43  ;;  %v4118_v43 = vld [vmem:[%s5519_s1 + $0xad4] ss:$8 sps:$4 sm:$0xff]  }
 0x13c   :  { %2831 = vmatpush2.bf16.msra.mxu1 %v4043_v44  ;;  %2791 = vmatprep.subr.bf16.mxu0 %v4048_v45  ;;  %v4121_v44 = vld [vmem:[%s5519_s1 + $0xbd4] ss:$8 sps:$4 sm:$0xff]   ;;  %v4116_v45 = vld [vmem:[%s5519_s1 + $0xad0] ss:$8 sps:$4 sm:$0xff]  }
 0x13d   :  { %2832 = vmatprep.subr.bf16.mxu1 %v4051_v46  ;;  %v4119_v46 = vld [vmem:[%s5519_s1 + $0xbd0] ss:$8 sps:$4 sm:$0xff]  }
 0x13f   :  { %2792 = vmatpush2.bf16.msra.mxu0 %v4046_v47  ;;  %v4124_v47 = vld [vmem:[%s5519_s1 + $0xac4] ss:$8 sps:$4 sm:$0xff]  }
 0x140   :  { %2833 = vmatpush2.bf16.msra.mxu1 %v4049_v48  ;;  %2843 = vmatprep.subr.bf16.mxu0 %v4058_v49  ;;  %v4127_v48 = vld [vmem:[%s5519_s1 + $0xbc4] ss:$8 sps:$4 sm:$0xff]   ;;  %v4122_v49 = vld [vmem:[%s5519_s1 + $0xac0] ss:$8 sps:$4 sm:$0xff]  }
 0x141   :  { %2884 = vmatprep.subr.bf16.mxu1 %v4061_v51  ;;  %v4125_v51 = vld [vmem:[%s5519_s1 + $0xbc0] ss:$8 sps:$4 sm:$0xff]  }
 0x142   :  { %v2549_v61 = vpop.f32.mrf.mxu0  ;;  %2794 = vmatmul.mubr.bf16.vlgmr.msra.gmra.mxu0 %v3125_v52  ;;  %v4130_v52 = vld [vmem:[%s5519_s1 + $0xab4] ss:$8 sps:$4 sm:$0xff]  }
 0x143   :  { %v2590_v62 = vpop.f32.mrf.mxu1  ;;  %2835 = vmatmul.mubr.bf16.vlgmr.msra.gmra.mxu1 %v3127_v53  ;;  %v2550_v63 = vadd.f32 %v2549_v61, %v5077_v50  ;;  %2844 = vmatpush1.bf16.msra.mxu0 %v4056_v57  ;;  %v4073_v50 = vld [vmem:[%s5519_s1 + $0xb54] ss:$8 sps:$4 sm:$0xff]   ;;  %v4128_v57 = vld [vmem:[%s5519_s1 + $0xab0] ss:$8 sps:$4 sm:$0xff]  }
 0x144   :  { %2885 = vmatpush1.bf16.msra.mxu1 %v4059_v34  ;;  %v2551_v2 = vpop.f32.mrf.mxu0  ;;  %2845 = vmatprep.subr.bf16.mxu0 %v4064_v35  ;;  %v4133_v53 = vld [vmem:[%s5519_s1 + $0xbb4] ss:$8 sps:$4 sm:$0xff]   ;;  %v4131_v34 = vld [vmem:[%s5519_s1 + $0xbb0] ss:$8 sps:$4 sm:$0xff]   ;;  %v4136_v35 = vld [vmem:[%s5519_s1 + $0xaa4] ss:$8 sps:$4 sm:$0xff]  }
 0x145   :  { %v2592_v3 = vpop.f32.mrf.mxu1  ;;  %2886 = vmatprep.subr.bf16.mxu1 %v4067_v58  ;;  %v5292_v5 = vadd.f32 %v2590_v62, %v2550_v63  ;;  %v2552_v6 = vadd.f32 %v2551_v2, %v5079_v54  ;;  %2875 = vmatprep.mubr.bf16.mxu0 %v3130_v59  ;;  %v4076_v54 = vld [vmem:[%s5519_s1 + $0xa44] ss:$8 sps:$4 sm:$0xff]   ;;  %v4134_v59 = vld [vmem:[%s5519_s1 + $0xaa0] ss:$8 sps:$4 sm:$0xff]   ;;  %v4142_v61 = vld [vmem:[%s5519_s1 + $0xa94] ss:$8 sps:$4 sm:$0xff]  }
 0x146   :  { %2916 = vmatprep.mubr.bf16.mxu1 %v3132_v60  ;;  %v2553_v7 = vpop.f32.mrf.mxu0  ;;  %v4139_v58 = vld [vmem:[%s5519_s1 + $0xba4] ss:$8 sps:$4 sm:$0xff]   ;;  %v4137_v60 = vld [vmem:[%s5519_s1 + $0xba0] ss:$8 sps:$4 sm:$0xff]   ;;  %v4145_v62 = vld [vmem:[%s5519_s1 + $0xb94] ss:$8 sps:$4 sm:$0xff]  }
 0x147   :  { %v2594_v8 = vpop.f32.mrf.mxu1  ;;  %v5295_v9 = vadd.f32 %v2592_v3, %v2552_v6  ;;  %2846 = vmatpush1.bf16.msra.mxu0 %v4062_v0  ;;  %v4140_v63 = vld [vmem:[%s5519_s1 + $0xa90] ss:$8 sps:$4 sm:$0xff]   ;;  %v4151_v2 = vld [vmem:[%s5519_s1 + $0xb84] ss:$8 sps:$4 sm:$0xff]   ;;  %v4146_v3 = vld [vmem:[%s5519_s1 + $0xa80] ss:$8 sps:$4 sm:$0xff]   ;;  %v3131_v6 = vcombine.low %v5261_v56, %v5261_v56 }
 0x148   :  { %2887 = vmatpush1.bf16.msra.mxu1 %v4065_v1  ;;  %v2554_v12 = vpop.f32.mrf.mxu0  ;;  %2847 = vmatprep.subr.bf16.mxu0 %v4070_v4  ;;  %v4143_v0 = vld [vmem:[%s5519_s1 + $0xb90] ss:$8 sps:$4 sm:$0xff]   ;;  %v4148_v1 = vld [vmem:[%s5519_s1 + $0xa84] ss:$8 sps:$4 sm:$0xff]   ;;  %v4149_v4 = vld [vmem:[%s5519_s1 + $0xb80] ss:$8 sps:$4 sm:$0xff]  }
 0x149   :  { %v2595_v13 = vpop.f32.mrf.mxu1  ;;  %2888 = vmatprep.subr.bf16.mxu1 %v4073_v50  ;;  %v3129_v50 = vcombine.low %v5256_v55, %v5256_v55  ;;  %v4156_v56 = vld [vmem:[%s5522_s3 + $0x78] sm:$0xff]  }
 0x14b   :  { %2848 = vmatpush1.bf16.msra.mxu0 %v4068_v10 }
 0x14c   :  { %2889 = vmatpush1.bf16.msra.mxu1 %v4071_v11  ;;  %2849 = vmatprep.subr.bf16.mxu0 %v4076_v54 }
 0x14d   :  { %2890 = vmatprep.subr.bf16.mxu1 %v4079_v14 }
 0x14f   :  { %2850 = vmatpush1.bf16.msra.mxu0 %v4074_v15 }
 0x150   :  { %2891 = vmatpush1.bf16.msra.mxu1 %v4077_v16  ;;  %2851 = vmatprep.subr.bf16.mxu0 %v4082_v17 }
 0x151   :  { %2892 = vmatprep.subr.bf16.mxu1 %v4085_v20  ;;  %v4157_v20 = vld [vmem:[%s5522_s3 + $0x38] sm:$0xff]  }
 0x153   :  { %2852 = vmatpush1.bf16.msra.mxu0 %v4080_v22  ;;  %v4160_v22 = vld [vmem:[%s5522_s3 + $0x68] sm:$0xff]  }
 0x154   :  { %2893 = vmatpush1.bf16.msra.mxu1 %v4083_v23  ;;  %2853 = vmatprep.subr.bf16.mxu0 %v4088_v25  ;;  %v4161_v23 = vld [vmem:[%s5522_s3 + $0x28] sm:$0xff]   ;;  %v4162_v25 = vld [vmem:[%s5522_s3 + $0x60] sm:$0xff]  }
 0x155   :  { %2894 = vmatprep.subr.bf16.mxu1 %v4091_v18  ;;  %v4163_v18 = vld [vmem:[%s5522_s3 + $0x20] sm:$0xff]  }
 0x157   :  { %2854 = vmatpush1.bf16.msra.mxu0 %v4086_v19  ;;  %v4164_v19 = vld [vmem:[%s5522_s3 + $0x58] sm:$0xff]  }
 0x158   :  { %2895 = vmatpush1.bf16.msra.mxu1 %v4089_v26  ;;  %2855 = vmatprep.subr.bf16.mxu0 %v4094_v27  ;;  %v4165_v26 = vld [vmem:[%s5522_s3 + $0x18] sm:$0xff]   ;;  %v4166_v27 = vld [vmem:[%s5522_s3 + $0x50] sm:$0xff]  }
 0x159   :  { %2896 = vmatprep.subr.bf16.mxu1 %v4097_v28  ;;  %v4167_v28 = vld [vmem:[%s5522_s3 + $0x10] sm:$0xff]  }
 0x15b   :  { %2856 = vmatpush1.bf16.msra.mxu0 %v4092_v29 }
 0x15c   :  { %2897 = vmatpush1.bf16.msra.mxu1 %v4095_v30  ;;  %2857 = vmatprep.subr.bf16.mxu0 %v4100_v31 }
 0x15d   :  { %2898 = vmatprep.subr.bf16.mxu1 %v4103_v32 }
 0x15f   :  { %2858 = vmatpush1.bf16.msra.mxu0 %v4098_v33 }
 0x160   :  { %2899 = vmatpush1.bf16.msra.mxu1 %v4101_v36  ;;  %2859 = vmatprep.subr.bf16.mxu0 %v4106_v21  ;;  %v4168_v36 = vld [vmem:[%s5522_s3 + $0x48] sm:$0xff]  }
 0x161   :  { %2900 = vmatprep.subr.bf16.mxu1 %v4109_v24 }
 0x163   :  { %2860 = vmatpush2.bf16.msra.mxu0 %v4104_v37  ;;  %v4169_v37 = vld [vmem:[%s5522_s3 + $0x8] sm:$0xff]  }
 0x164   :  { %2901 = vmatpush2.bf16.msra.mxu1 %v4107_v38  ;;  %2861 = vmatprep.subr.bf16.mxu0 %v4112_v39 }
 0x165   :  { %2902 = vmatprep.subr.bf16.mxu1 %v4115_v40 }
 0x167   :  { %2862 = vmatpush2.bf16.msra.mxu0 %v4110_v41 }
 0x168   :  { %2903 = vmatpush2.bf16.msra.mxu1 %v4113_v42  ;;  %2863 = vmatprep.subr.bf16.mxu0 %v4118_v43  ;;  %v4170_v43 = vld [vmem:[%s5522_s3 + $0x40] sm:$0xff]  }
 0x169   :  { %2904 = vmatprep.subr.bf16.mxu1 %v4121_v44  ;;  %v4171_v44 = vld [vmem:[%s5522_s3] sm:$0xff]  }
 0x16b   :  { %2864 = vmatpush2.bf16.msra.mxu0 %v4116_v45 }
 0x16c   :  { %2905 = vmatpush2.bf16.msra.mxu1 %v4119_v46  ;;  %2865 = vmatprep.subr.bf16.mxu0 %v4124_v47 }
 0x16d   :  { %2906 = vmatprep.subr.bf16.mxu1 %v4127_v48 }
 0x16f   :  { %2866 = vmatpush2.bf16.msra.mxu0 %v4122_v49 }
 0x170   :  { %2907 = vmatpush2.bf16.msra.mxu1 %v4125_v51  ;;  %2867 = vmatprep.subr.bf16.mxu0 %v4130_v52 }
 0x171   :  { %2908 = vmatprep.subr.bf16.mxu1 %v4133_v53 }
 0x173   :  { %2868 = vmatpush2.bf16.msra.mxu0 %v4128_v57 }
 0x174   :  { %2909 = vmatpush2.bf16.msra.mxu1 %v4131_v34  ;;  %2869 = vmatprep.subr.bf16.mxu0 %v4136_v35 }
 0x175   :  { %2910 = vmatprep.subr.bf16.mxu1 %v4139_v58 }
 0x177   :  { %2870 = vmatpush2.bf16.msra.mxu0 %v4134_v59 }
 0x178   :  { %2911 = vmatpush2.bf16.msra.mxu1 %v4137_v60  ;;  %2871 = vmatprep.subr.bf16.mxu0 %v4142_v61 }
 0x179   :  { %2912 = vmatprep.subr.bf16.mxu1 %v4145_v62 }
 0x17b   :  { %2872 = vmatpush2.bf16.msra.mxu0 %v4140_v63 }
 0x17c   :  { %2913 = vmatpush2.bf16.msra.mxu1 %v4143_v0  ;;  %2873 = vmatprep.subr.bf16.mxu0 %v4148_v1 }
 0x17d   :  { %2914 = vmatprep.subr.bf16.mxu1 %v4151_v2 }
 0x17f   :  { %2874 = vmatpush2.bf16.msra.mxu0 %v4146_v3 }
 0x180   :  { %2915 = vmatpush2.bf16.msra.mxu1 %v4149_v4  ;;  %3534 = vmatprep.subr.bf16.mxu0 %v4156_v56 }
 0x182   :  { %v2631_v7 = vpop.f32.mrf.mxu0  ;;  %2876 = vmatmul.mubr.bf16.vlgmr.msra.gmra.mxu0 %v3129_v50 }
 0x183   :  { %v2672_v8 = vpop.f32.mrf.mxu1  ;;  %2917 = vmatmul.mubr.bf16.vlgmr.msra.gmra.mxu1 %v3131_v6  ;;  %v2632_v10 = vadd.f32 %v2631_v7, %v5292_v5  ;;  %v4158_v5 = vld [vmem:[%s5522_s3 + $0x70] sm:$0xff]   ;;  %3535 = vmatpush3.bf16.msra.mxu0 %v4157_v20 }
 0x184   :  { %v2633_v11 = vpop.f32.mrf.mxu0  ;;  %3536 = vmatprep.subr.bf16.mxu0 %v4158_v5 }
 0x185   :  { %v2674_v12 = vpop.f32.mrf.mxu1  ;;  %v2673_v13 = vadd.f32 %v2672_v8, %v2632_v10  ;;  %v2634_v54 = vadd.f32 %v2633_v11, %v5295_v9  ;;  %v4159_v9 = vld [vmem:[%s5522_s3 + $0x30] sm:$0xff]  }
 0x186   :  { %v2635_v14 = vpop.f32.mrf.mxu0 }
 0x187   :  { %v2676_v15 = vpop.f32.mrf.mxu1  ;;  %v2675_v16 = vadd.f32 %v2674_v12, %v2634_v54  ;;  %3537 = vmatpush3.bf16.msra.mxu0 %v4159_v9 }
 0x188   :  { %v2636_v55 = vpop.f32.mrf.mxu0  ;;  %3538 = vmatprep.subr.bf16.mxu0 %v4160_v22 }
 0x189   :  { %v2677_v17 = vpop.f32.mrf.mxu1 }
 0x18b   :  { %3539 = vmatpush3.bf16.msra.mxu0 %v4161_v23 }
 0x18c   :  { %3540 = vmatprep.subr.bf16.mxu0 %v4162_v25 }
 0x18f   :  { %3541 = vmatpush3.bf16.msra.mxu0 %v4163_v18 }
 0x190   :  { %3542 = vmatprep.subr.bf16.mxu0 %v4164_v19 }
 0x193   :  { %3543 = vmatpush3.bf16.msra.mxu0 %v4165_v26 }
 0x194   :  { %3544 = vmatprep.subr.bf16.mxu0 %v4166_v27 }
 0x197   :  { %3545 = vmatpush3.bf16.msra.mxu0 %v4167_v28 }
 0x198   :  { %3546 = vmatprep.subr.bf16.mxu0 %v4168_v36 }
 0x19b   :  { %3547 = vmatpush3.bf16.msra.mxu0 %v4169_v37 }
 0x19c   :  { %3548 = vmatprep.subr.bf16.mxu0 %v4170_v43 }
 0x19f   :  { %3549 = vmatpush3.bf16.msra.mxu0 %v4171_v44 }
 0x1c2   :  { %v2713_v29 = vpop.f32.mrf.mxu0 }
 0x1c3   :  { %v2754_v30 = vpop.f32.mrf.mxu1  ;;  %v2714_v31 = vadd.f32 %v2713_v29, %v2673_v13  ;;  %v3517_v13 = vld [vmem:[%s5523_s4] ss:$0 sm:$0xff] }
 0x1c4   :  { %v2715_v32 = vpop.f32.mrf.mxu0 }
 0x1c5   :  { %v2756_v33 = vpop.f32.mrf.mxu1  ;;  %v2755_v21 = vadd.f32 %v2754_v30, %v2714_v31  ;;  %v2716_v24 = vadd.f32 %v2715_v32, %v2675_v16 }
 0x1c6   :  { %v2717_v38 = vpop.f32.mrf.mxu0 }
 0x1c7   :  { %v2758_v39 = vpop.f32.mrf.mxu1  ;;  %v2757_v40 = vadd.f32 %v2756_v33, %v2716_v24 }
 0x1c8   :  { %v2718_v41 = vpop.f32.mrf.mxu0 }
 0x1c9   :  { %v2759_v42 = vpop.f32.mrf.mxu1 }
 0x202   :  { %v2795_v45 = vpop.f32.mrf.mxu0 }
 0x203   :  { %v2836_v46 = vpop.f32.mrf.mxu1  ;;  %v2796_v47 = vadd.f32 %v2795_v45, %v2755_v21 }
 0x204   :  { %v2797_v48 = vpop.f32.mrf.mxu0 }
 0x205   :  { %v2838_v49 = vpop.f32.mrf.mxu1  ;;  %v2837_v51 = vadd.f32 %v2836_v46, %v2796_v47  ;;  %v2798_v35 = vadd.f32 %v2797_v48, %v2757_v40 }
 0x206   :  { %v2799_v52 = vpop.f32.mrf.mxu0 }
 0x207   :  { %v2840_v53 = vpop.f32.mrf.mxu1  ;;  %v2839_v60 = vadd.f32 %v2838_v49, %v2798_v35 }
 0x208   :  { %v2800_v57 = vpop.f32.mrf.mxu0 }
 0x209   :  { %v2841_v34 = vpop.f32.mrf.mxu1 }
 0x242   :  { %v2877_v58 = vpop.f32.mrf.mxu0 }
 0x243   :  { %v2918_v59 = vpop.f32.mrf.mxu1  ;;  %v2878_v61 = vadd.f32 %v2877_v58, %v2837_v51 }
 0x244   :  { %v2879_v62 = vpop.f32.mrf.mxu0 }
 0x245   :  { %v2920_v63 = vpop.f32.mrf.mxu1  ;;  %v2919_v0 = vadd.f32 %v2918_v59, %v2878_v61  ;;  %v2880_v1 = vadd.f32 %v2879_v62, %v2839_v60 }
 0x246   :  { %v2881_v2 = vpop.f32.mrf.mxu0 }
 0x247   :  { %v2922_v3 = vpop.f32.mrf.mxu1  ;;  %v2921_v4 = vadd.f32 %v2920_v63, %v2880_v1  ;;  %v2925_v50 = vmax.f32 %v2919_v0, 0.0 }
 0x248   :  { %v2882_v6 = vpop.f32.mrf.mxu0 }
 0x249   :  { %v2923_v7 = vpop.f32.mrf.mxu1  ;;  %v2926_v8 = vmax.f32 %v2921_v4, 0.0  ;;  %v2927_v11 = vpack.c.bf16 %v2925_v50, %v2925_v50 }
 0x24b   :  { %v2928_v10 = vpack.c.bf16 %v2926_v8, %v2926_v8 }
 0x24d   :  { %3096 = vmatprep.mubr.bf16.mxu0 %v2928_v10 }
 0x24e   :  { %3097 = vmatmul.mubr.bf16.vlgmr.msra.gmra.mxu0 %v2927_v11 }
 0x30e   :  { %v3550_v12 = vpop.f32.mrf.mxu0 }
 0x310   :  { %v3551_v54 = vpop.f32.mrf.mxu0 }
 0x311   :  { %v3552_v14 = vadd.f32 %v3551_v54, %v3550_v12 }
 0x312   :  { %v3553_v15 = vpop.f32.mrf.mxu0 }
 0x313   :  { %v3099_v16 = vadd.f32 %v3552_v14, %v3517_v13 }
 0x314   :  { %v3554_v55 = vpop.f32.mrf.mxu0 }
 0x315   :  { %3104 = vst [vmem:[%s5524_s5] sm:$0xff] %v3099_v16 }

</bundles_post_ra>
